<compile_context>
chip_gen: v6e
topology: v6e:2x2x1
jax: 0.10.0
libtpu: 0.0.40
codegen_flags: <defaults>
</compile_context>

<pallas_src>
import functools

import jax
import jax.numpy as jnp
from jax.experimental import pallas as pl
from jax.experimental.pallas import tpu as pltpu


_VMEM_LIMIT = 32 * 1024 * 1024   # explicit scoped-VMEM budget, safe on v5e/v6e/v7x


def _round_up(x, m):
    return (x + m - 1) // m * m


def _pick_tm(bh):
    """B*H tile: largest power-of-two-ish divisor, preferring >=2 grid steps."""
    for t in (256, 128, 64, 32, 16, 8):
        if bh % t == 0 and bh // t >= 2:
            return t
    for t in (256, 128, 64, 32, 16, 8):
        if bh % t == 0:
            return t
    return bh


# --------------------------------------------------------------------------
# Phase 1: spatial 1x1 channel-mixing conv (single dense MXU matmul)
# --------------------------------------------------------------------------
def _conv_kernel(w_ref, x_ref, u_ref):
    # w: (4*Cout, C) bf16, x block: (C, TM*W) bf16 -> u block: (4*Cout, TM*W)
    u_ref[...] = jnp.dot(w_ref[...], x_ref[...],
                         preferred_element_type=jnp.float32).astype(u_ref.dtype)


# --------------------------------------------------------------------------
# Phase 2: rfft (ortho DFT matmuls) + spectral y + BN s1/s2 accumulation
# --------------------------------------------------------------------------
def _rfft_stats_kernel(u_ref, fr_ref, fi_ref, y_ref, stat_ref, *, c2, tm):
    w = u_ref.shape[-1]
    wf_pad = fr_ref.shape[-1]

    u = u_ref[...]                                   # (2*c2, tm, w) bf16
    ur = u[:c2].reshape(c2 * tm, w)                  # leading-axis reshape (free)
    ui = u[c2:].reshape(c2 * tm, w)

    # spectral y = u_r @ FR + u_i @ FI   (rows = (channel, bh), lanes = freq)
    y2 = (jnp.dot(ur, fr_ref[...], preferred_element_type=jnp.float32)
          + jnp.dot(ui, fi_ref[...], preferred_element_type=jnp.float32))
    y3 = y2.reshape(c2, tm, wf_pad)                  # leading split (free)
    y_ref[...] = y3.astype(y_ref.dtype)              # lane-dense bf16 spill

    # Per-channel partial sums (padded freq columns are exactly zero).
    ps1 = jnp.sum(jnp.sum(y3, axis=2), axis=1, keepdims=True)        # (c2, 1)
    ps2 = jnp.sum(jnp.sum(y3 * y3, axis=2), axis=1, keepdims=True)   # (c2, 1)
    stat = jnp.concatenate([ps1, ps2], axis=1)                       # (c2, 2)

    @pl.when(pl.program_id(0) == 0)
    def _init():
        stat_ref[...] = jnp.zeros_like(stat_ref)

    stat_ref[...] += stat


# --------------------------------------------------------------------------
# Phase 3: folded BN (scale/shift) + ReLU + irfft (ortho DFT matmuls)
# --------------------------------------------------------------------------
def _norm_irfft_kernel(y_ref, sc_ref, sh_ref, br_ref, bi_ref, o_ref, *, cout, tm):
    c2 = 2 * cout
    wf_pad = y_ref.shape[-1]
    w_pad = br_ref.shape[-1]

    y = y_ref[...].reshape(c2 * tm, wf_pad).astype(jnp.float32)
    # BN folded to one FMA per element, then ReLU, then cast for the MXU.
    yh = jnp.maximum(y * sc_ref[...] + sh_ref[...], 0.0).astype(br_ref.dtype)

    yre = yh[:cout * tm]                              # leading-row slices (free)
    yim = yh[cout * tm:]
    out = (jnp.dot(yre, br_ref[...], preferred_element_type=jnp.float32)
           + jnp.dot(yim, bi_ref[...], preferred_element_type=jnp.float32))
    o_ref[...] = out.reshape(cout, tm, w_pad).astype(o_ref.dtype)


# --------------------------------------------------------------------------
# DFT bases (ortho), zero-padded for lane density
# --------------------------------------------------------------------------
def _dft_matrices(w, wf_pad, w_pad, dtype):
    wf = w // 2 + 1
    nn = jnp.arange(w, dtype=jnp.float32)
    kk = jnp.arange(wf, dtype=jnp.float32)
    scale = 1.0 / jnp.sqrt(jnp.float32(w))
    ang = 2.0 * jnp.pi * jnp.outer(nn, kk) / w                      # (w, wf)
    fr = jnp.cos(ang) * scale
    fi = -jnp.sin(ang) * scale
    # Hermitian weights for the inverse real transform.
    c = jnp.full((wf,), 2.0, jnp.float32).at[0].set(1.0)
    if w % 2 == 0:
        c = c.at[wf - 1].set(1.0)
    ang_t = 2.0 * jnp.pi * jnp.outer(kk, nn) / w                    # (wf, w)
    br = c[:, None] * jnp.cos(ang_t) * scale
    bi = -c[:, None] * jnp.sin(ang_t) * scale
    # Zero-pad: freq axis -> wf_pad lanes, output width -> w_pad lanes.
    fr = jnp.zeros((w, wf_pad), jnp.float32).at[:, :wf].set(fr)
    fi = jnp.zeros((w, wf_pad), jnp.float32).at[:, :wf].set(fi)
    br = jnp.zeros((wf_pad, w_pad), jnp.float32).at[:wf, :w].set(br)
    bi = jnp.zeros((wf_pad, w_pad), jnp.float32).at[:wf, :w].set(bi)
    return fr.astype(dtype), fi.astype(dtype), br.astype(dtype), bi.astype(dtype)


# --------------------------------------------------------------------------
# Wrapper
# --------------------------------------------------------------------------
def fourier_unit_pallas(x, w_conv, gamma, beta, eps=1e-5):
    """x: NCHW float32; w_conv: (2*Cout, 2*Cin); gamma/beta: (2*Cout,)."""
    f32, bf16 = jnp.float32, jnp.bfloat16
    B, C, H, W = x.shape
    c2 = w_conv.shape[0]                      # 2*Cout (BN channel count)
    cout = c2 // 2
    c4 = 2 * c2                               # stacked [u_r ; u_i] channels
    wf = W // 2 + 1
    wf_pad = _round_up(wf, 128)
    w_pad = _round_up(W, 128)
    bh = B * H
    tm = _pick_tm(bh)
    nt = bh // tm
    tn = tm * W

    # ---- parameter packing: permute output channels to [all re | all im] ----
    perm = jnp.concatenate([jnp.arange(0, c2, 2), jnp.arange(1, c2, 2)])
    w_perm = w_conv[perm]                     # (c2, 2C)
    wr = w_perm[:, 0::2]                      # mixes Re(rfft) input channels
    wi = w_perm[:, 1::2]                      # mixes Im(rfft) input channels
    wstk = jnp.concatenate([wr, wi], axis=0).astype(bf16)          # (c4, C)
    gamma_p = gamma[perm].astype(f32)
    beta_p = beta[perm].astype(f32)

    fr, fi, br, bi = _dft_matrices(W, wf_pad, w_pad, bf16)

    # ---- layout: NCHW -> (C, B*H*W): channel-contractable, lane-dense ----
    xc = jnp.transpose(x, (1, 0, 2, 3)).reshape(C, bh * W).astype(bf16)

    # ---- phase 1: spatial 1x1 conv (one matmul per tile) ----
    u = pl.pallas_call(
        _conv_kernel,
        out_shape=jax.ShapeDtypeStruct((c4, bh * W), bf16),
        grid=(nt,),
        in_specs=[pl.BlockSpec((c4, C), lambda i: (0, 0)),
                  pl.BlockSpec((C, tn), lambda i: (0, i))],
        out_specs=pl.BlockSpec((c4, tn), lambda i: (0, i)),
        compiler_params=pltpu.CompilerParams(
            dimension_semantics=("parallel",),
            vmem_limit_bytes=_VMEM_LIMIT),
    )(wstk, xc)

    # ---- phase 2: rfft + spectral y + BN stats accumulation ----
    u3 = u.reshape(c4, bh, W)                 # free HBM reshape
    y, stats = pl.pallas_call(
        functools.partial(_rfft_stats_kernel, c2=c2, tm=tm),
        out_shape=(jax.ShapeDtypeStruct((c2, bh, wf_pad), bf16),
                   jax.ShapeDtypeStruct((c2, 2), f32)),
        grid=(nt,),
        in_specs=[pl.BlockSpec((c4, tm, W), lambda i: (0, i, 0)),
                  pl.BlockSpec((W, wf_pad), lambda i: (0, 0)),
                  pl.BlockSpec((W, wf_pad), lambda i: (0, 0))],
        out_specs=(pl.BlockSpec((c2, tm, wf_pad), lambda i: (0, i, 0)),
                   pl.BlockSpec((c2, 2), lambda i: (0, 0))),
        compiler_params=pltpu.CompilerParams(
            dimension_semantics=("arbitrary",),    # accumulator output revisited
            vmem_limit_bytes=_VMEM_LIMIT),
    )(u3, fr, fi)

    # ---- BN stats finalize (O(channels) glue, as recommended) ----
    # NOTE: plain f32 sum-of-squares; for very large B*H*Wf prefer per-tile
    # Welford-style accumulation (see review correctness note).
    cnt = jnp.float32(bh * wf)
    mean = stats[:, 0] / cnt
    var = stats[:, 1] / cnt - mean * mean      # biased batch variance (training BN)
    scale = gamma_p / jnp.sqrt(var + eps)
    shift = beta_p - mean * scale
    sc_rows = jnp.repeat(scale, tm).reshape(c2 * tm, 1).astype(f32)
    sh_rows = jnp.repeat(shift, tm).reshape(c2 * tm, 1).astype(f32)

    # ---- phase 3: normalize + ReLU + irfft (lane-dense output, sliced later) ----
    out = pl.pallas_call(
        functools.partial(_norm_irfft_kernel, cout=cout, tm=tm),
        out_shape=jax.ShapeDtypeStruct((cout, bh, w_pad), f32),
        grid=(nt,),
        in_specs=[pl.BlockSpec((c2, tm, wf_pad), lambda i: (0, i, 0)),
                  pl.BlockSpec((c2 * tm, 1), lambda i: (0, 0)),
                  pl.BlockSpec((c2 * tm, 1), lambda i: (0, 0)),
                  pl.BlockSpec((wf_pad, w_pad), lambda i: (0, 0)),
                  pl.BlockSpec((wf_pad, w_pad), lambda i: (0, 0))],
        out_specs=pl.BlockSpec((cout, tm, w_pad), lambda i: (0, i, 0)),
        compiler_params=pltpu.CompilerParams(
            dimension_semantics=("parallel",),
            vmem_limit_bytes=_VMEM_LIMIT),
    )(y, sc_rows, sh_rows, br, bi)

    # back to NCHW (drop the zero-padded output columns)
    out = out[:, :, :W].reshape(cout, B, H, W)
    return jnp.transpose(out, (1, 0, 2, 3))


# --------------------------------------------------------------------------
# Pure-JAX reference mirroring the PyTorch forward (training-mode BN)
# --------------------------------------------------------------------------
def fourier_unit_reference(x, w_conv, gamma, beta, eps=1e-5):
    B, C, H, W = x.shape
    ff = jnp.fft.rfft(x, axis=-1, norm="ortho")
    ffr = jnp.stack([ff.real, ff.imag], axis=2).reshape(B, 2 * C, H, -1)
    y = jnp.einsum("oi,bihw->bohw", w_conv, ffr)
    mean = y.mean(axis=(0, 2, 3), keepdims=True)
    var = ((y - mean) ** 2).mean(axis=(0, 2, 3), keepdims=True)
    yn = (y - mean) / jnp.sqrt(var + eps) * gamma.reshape(1, -1, 1, 1) \
         + beta.reshape(1, -1, 1, 1)
    yr = jnp.maximum(yn, 0.0)
    Wf = yr.shape[-1]
    yc = yr.reshape(B, -1, 2, H, Wf)
    comp = yc[:, :, 0] + 1j * yc[:, :, 1]
    return jnp.fft.irfft(comp, n=W, axis=-1, norm="ortho")


if __name__ == "__main__":
    key = jax.random.PRNGKey(0)
    kx, k1, k2, k3 = jax.random.split(key, 4)

    B, Cin, H, W = 2, 4, 16, 16
    Cout = 4   # FourierUnit(in_channels=4, out_channels=4)

    x = jax.random.normal(kx, (B, Cin, H, W), jnp.float32)
    w_conv = 0.1 * jax.random.normal(k1, (2 * Cout, 2 * Cin), jnp.float32)
    gamma = 1.0 + 0.05 * jax.random.normal(k2, (2 * Cout,), jnp.float32)
    beta = 0.05 * jax.random.normal(k3, (2 * Cout,), jnp.float32)

    fn = jax.jit(fourier_unit_pallas)
    out = jax.block_until_ready(fn(x, w_conv, gamma, beta))
    assert out.shape == (B, Cout, H, W)

    ref = fourier_unit_reference(x, w_conv, gamma, beta)
    # bf16 MXU operands (f32 accumulation) across three chained matmul stages
    # plus variance normalization -> allow a few e-2 slack vs the f32 reference.
    if not bool(jnp.allclose(out, ref, atol=5e-2, rtol=5e-2)):
        raise AssertionError("Pallas kernel output mismatches JAX reference")

    print("KERNEL_OK")
</pallas_src>

<mosaic_0001>
module attributes {stable_mosaic.version = 11 : i64} {
  func.func @_rfft_stats_kernel(%arg0: i32, %arg1: memref<16x16x16xbf16, #tpu.memory_space<vmem>>, %arg2: memref<16x128xbf16, #tpu.memory_space<vmem>>, %arg3: memref<16x128xbf16, #tpu.memory_space<vmem>>, %arg4: memref<8x16x128xbf16, #tpu.memory_space<vmem>>, %arg5: memref<8x2xf32, #tpu.memory_space<vmem>>) attributes {dimension_semantics = [#tpu.dimension_semantics<arbitrary>], iteration_bounds = array<i64: 2>, scalar_prefetch = 0 : i64, scratch_operands = 0 : i64, tpu.core_type = #tpu.core_type<tc>, window_params = [{transform_indices = @transform_0, window_bounds = array<i64: 16, 16, 16>}, {pipeline_mode = #tpu.pipeline_mode<synchronous>, transform_indices = @transform_1, window_bounds = array<i64: 16, 128>}, {pipeline_mode = #tpu.pipeline_mode<synchronous>, transform_indices = @transform_2, window_bounds = array<i64: 16, 128>}, {transform_indices = @transform_3, window_bounds = array<i64: 8, 16, 128>}, {pipeline_mode = #tpu.pipeline_mode<synchronous>, transform_indices = @transform_4, window_bounds = array<i64: 8, 2>}]} {
    %c0 = arith.constant 0 : index
    %c0_0 = arith.constant 0 : index
    %c0_1 = arith.constant 0 : index
    %0 = vector.load %arg1[%c0, %c0_0, %c0_1] : memref<16x16x16xbf16, #tpu.memory_space<vmem>>, vector<16x16x16xbf16>
    %1 = vector.extract_strided_slice %0 {offsets = [0, 0, 0], sizes = [8, 16, 16], strides = [1, 1, 1]} : vector<16x16x16xbf16> to vector<8x16x16xbf16>
    %2 = vector.shape_cast %1 : vector<8x16x16xbf16> to vector<128x16xbf16>
    %3 = vector.extract_strided_slice %0 {offsets = [8, 0, 0], sizes = [8, 16, 16], strides = [1, 1, 1]} : vector<16x16x16xbf16> to vector<8x16x16xbf16>
    %4 = vector.shape_cast %3 : vector<8x16x16xbf16> to vector<128x16xbf16>
    %c0_2 = arith.constant 0 : index
    %c0_3 = arith.constant 0 : index
    %5 = vector.load %arg2[%c0_2, %c0_3] : memref<16x128xbf16, #tpu.memory_space<vmem>>, vector<16x128xbf16>
    %cst = arith.constant dense<0.000000e+00> : vector<128x128xf32>
    %6 = tpu.matmul %2, %5, %cst {dimension_numbers = #tpu.dot_dimension_numbers<[1], [0], [0], [1], [0, 0, 1, 1], [], []>} : vector<128x16xbf16>, vector<16x128xbf16>, vector<128x128xf32> -> vector<128x128xf32>
    %c0_4 = arith.constant 0 : index
    %c0_5 = arith.constant 0 : index
    %7 = vector.load %arg3[%c0_4, %c0_5] : memref<16x128xbf16, #tpu.memory_space<vmem>>, vector<16x128xbf16>
    %cst_6 = arith.constant dense<0.000000e+00> : vector<128x128xf32>
    %8 = tpu.matmul %4, %7, %cst_6 {dimension_numbers = #tpu.dot_dimension_numbers<[1], [0], [0], [1], [0, 0, 1, 1], [], []>} : vector<128x16xbf16>, vector<16x128xbf16>, vector<128x128xf32> -> vector<128x128xf32>
    %9 = arith.addf %6, %8 : vector<128x128xf32>
    %10 = vector.shape_cast %9 : vector<128x128xf32> to vector<8x16x128xf32>
    %11 = arith.truncf %10 : vector<8x16x128xf32> to vector<8x16x128xbf16>
    %c0_7 = arith.constant 0 : index
    %c0_8 = arith.constant 0 : index
    %c0_9 = arith.constant 0 : index
    %12 = vector.load %arg4[%c0_7, %c0_8, %c0_9] : memref<8x16x128xbf16, #tpu.memory_space<vmem>>, vector<8x16x128xbf16>
    tpu.vector_store %arg4[%c0_7, %c0_8, %c0_9], %11 {strides = array<i32>} : memref<8x16x128xbf16, #tpu.memory_space<vmem>>, vector<8x16x128xbf16>,
    %cst_10 = arith.constant dense<0.000000e+00> : vector<8x16xf32>
    %13 = vector.multi_reduction <add>, %10, %cst_10 [2] : vector<8x16x128xf32> to vector<8x16xf32>
    %cst_11 = arith.constant dense<0.000000e+00> : vector<8xf32>
    %14 = vector.multi_reduction <add>, %13, %cst_11 [1] : vector<8x16xf32> to vector<8xf32>
    %15 = vector.shape_cast %14 : vector<8xf32> to vector<8x1xf32>
    %16 = arith.mulf %10, %10 : vector<8x16x128xf32>
    %cst_12 = arith.constant dense<0.000000e+00> : vector<8x16xf32>
    %17 = vector.multi_reduction <add>, %16, %cst_12 [2] : vector<8x16x128xf32> to vector<8x16xf32>
    %cst_13 = arith.constant dense<0.000000e+00> : vector<8xf32>
    %18 = vector.multi_reduction <add>, %17, %cst_13 [1] : vector<8x16xf32> to vector<8xf32>
    %19 = vector.shape_cast %18 : vector<8xf32> to vector<8x1xf32>
    %20 = tpu.concatenate %15, %19 in 1 : vector<8x1xf32>, vector<8x1xf32> -> vector<8x2xf32>
    %c0_i32 = arith.constant 0 : i32
    %21 = arith.cmpi eq, %arg0, %c0_i32 : i32
    %22 = arith.extui %21 : i1 to i32
    %c0_i32_14 = arith.constant 0 : i32
    %23 = arith.cmpi ne, %22, %c0_i32_14 : i32
    scf.if %23 {
      %cst_19 = arith.constant 0.000000e+00 : f32
      %27 = vector.broadcast %cst_19 : f32 to vector<8x2xf32>
      %c0_20 = arith.constant 0 : index
      %c0_21 = arith.constant 0 : index
      %28 = vector.load %arg5[%c0_20, %c0_21] : memref<8x2xf32, #tpu.memory_space<vmem>>, vector<8x2xf32>
      tpu.vector_store %arg5[%c0_20, %c0_21], %27 {strides = array<i32>} : memref<8x2xf32, #tpu.memory_space<vmem>>, vector<8x2xf32>,
    } else {
    }
    %c0_15 = arith.constant 0 : index
    %c0_16 = arith.constant 0 : index
    %24 = vector.load %arg5[%c0_15, %c0_16] : memref<8x2xf32, #tpu.memory_space<vmem>>, vector<8x2xf32>
    %25 = arith.addf %24, %20 : vector<8x2xf32>
    %c0_17 = arith.constant 0 : index
    %c0_18 = arith.constant 0 : index
    %26 = vector.load %arg5[%c0_17, %c0_18] : memref<8x2xf32, #tpu.memory_space<vmem>>, vector<8x2xf32>
    tpu.vector_store %arg5[%c0_17, %c0_18], %25 {strides = array<i32>} : memref<8x2xf32, #tpu.memory_space<vmem>>, vector<8x2xf32>,
    return
  }
  func.func @transform_0(%arg0: i32) -> (i32, i32, i32) {
    %c0_i32 = arith.constant 0 : i32
    %c0_i32_0 = arith.constant 0 : i32
    %c0_i32_1 = arith.constant 0 : i32
    return %c0_i32, %arg0, %c0_i32_0 : i32, i32, i32
  }
  func.func @transform_1(%arg0: i32) -> (i32, i32) {
    %c0_i32 = arith.constant 0 : i32
    %c0_i32_0 = arith.constant 0 : i32
    %c0_i32_1 = arith.constant 0 : i32
    return %c0_i32, %c0_i32_0 : i32, i32
  }
  func.func @transform_2(%arg0: i32) -> (i32, i32) {
    %c0_i32 = arith.constant 0 : i32
    %c0_i32_0 = arith.constant 0 : i32
    %c0_i32_1 = arith.constant 0 : i32
    return %c0_i32, %c0_i32_0 : i32, i32
  }
  func.func @transform_3(%arg0: i32) -> (i32, i32, i32) {
    %c0_i32 = arith.constant 0 : i32
    %c0_i32_0 = arith.constant 0 : i32
    %c0_i32_1 = arith.constant 0 : i32
    return %c0_i32, %arg0, %c0_i32_0 : i32, i32, i32
  }
  func.func @transform_4(%arg0: i32) -> (i32, i32) {
    %c0_i32 = arith.constant 0 : i32
    %c0_i32_0 = arith.constant 0 : i32
    %c0_i32_1 = arith.constant 0 : i32
    return %c0_i32, %c0_i32_0 : i32, i32
  }
}

module attributes {stable_mosaic.version = 11 : i64} {
  func.func @_conv_kernel(%arg0: i32, %arg1: memref<16x4xbf16, #tpu.memory_space<vmem>>, %arg2: memref<4x256xbf16, #tpu.memory_space<vmem>>, %arg3: memref<16x256xbf16, #tpu.memory_space<vmem>>) attributes {dimension_semantics = [#tpu.dimension_semantics<parallel>], iteration_bounds = array<i64: 2>, scalar_prefetch = 0 : i64, scratch_operands = 0 : i64, tpu.core_type = #tpu.core_type<tc>, window_params = [{pipeline_mode = #tpu.pipeline_mode<synchronous>, transform_indices = @transform_0, window_bounds = array<i64: 16, 4>}, {transform_indices = @transform_1, window_bounds = array<i64: 4, 256>}, {transform_indices = @transform_2, window_bounds = array<i64: 16, 256>}]} {
    %c0 = arith.constant 0 : index
    %c0_0 = arith.constant 0 : index
    %0 = vector.load %arg1[%c0, %c0_0] : memref<16x4xbf16, #tpu.memory_space<vmem>>, vector<16x4xbf16>
    %c0_1 = arith.constant 0 : index
    %c0_2 = arith.constant 0 : index
    %1 = vector.load %arg2[%c0_1, %c0_2] : memref<4x256xbf16, #tpu.memory_space<vmem>>, vector<4x256xbf16>
    %cst = arith.constant dense<0.000000e+00> : vector<16x256xf32>
    %2 = tpu.matmul %0, %1, %cst {dimension_numbers = #tpu.dot_dimension_numbers<[1], [0], [0], [1], [0, 0, 1, 1], [], []>} : vector<16x4xbf16>, vector<4x256xbf16>, vector<16x256xf32> -> vector<16x256xf32>
    %3 = arith.truncf %2 : vector<16x256xf32> to vector<16x256xbf16>
    %c0_3 = arith.constant 0 : index
    %c0_4 = arith.constant 0 : index
    %4 = vector.load %arg3[%c0_3, %c0_4] : memref<16x256xbf16, #tpu.memory_space<vmem>>, vector<16x256xbf16>
    tpu.vector_store %arg3[%c0_3, %c0_4], %3 {strides = array<i32>} : memref<16x256xbf16, #tpu.memory_space<vmem>>, vector<16x256xbf16>,
    return
  }
  func.func @transform_0(%arg0: i32) -> (i32, i32) {
    %c0_i32 = arith.constant 0 : i32
    %c0_i32_0 = arith.constant 0 : i32
    %c0_i32_1 = arith.constant 0 : i32
    return %c0_i32, %c0_i32_0 : i32, i32
  }
  func.func @transform_1(%arg0: i32) -> (i32, i32) {
    %c0_i32 = arith.constant 0 : i32
    %c0_i32_0 = arith.constant 0 : i32
    return %c0_i32, %arg0 : i32, i32
  }
  func.func @transform_2(%arg0: i32) -> (i32, i32) {
    %c0_i32 = arith.constant 0 : i32
    %c0_i32_0 = arith.constant 0 : i32
    return %c0_i32, %arg0 : i32, i32
  }
}

module attributes {stable_mosaic.version = 11 : i64} {
  func.func @_norm_irfft_kernel(%arg0: i32, %arg1: memref<8x16x128xbf16, #tpu.memory_space<vmem>>, %arg2: memref<128x1xf32, #tpu.memory_space<vmem>>, %arg3: memref<128x1xf32, #tpu.memory_space<vmem>>, %arg4: memref<128x128xbf16, #tpu.memory_space<vmem>>, %arg5: memref<128x128xbf16, #tpu.memory_space<vmem>>, %arg6: memref<4x16x128xf32, #tpu.memory_space<vmem>>) attributes {dimension_semantics = [#tpu.dimension_semantics<parallel>], iteration_bounds = array<i64: 2>, scalar_prefetch = 0 : i64, scratch_operands = 0 : i64, tpu.core_type = #tpu.core_type<tc>, window_params = [{transform_indices = @transform_0, window_bounds = array<i64: 8, 16, 128>}, {pipeline_mode = #tpu.pipeline_mode<synchronous>, transform_indices = @transform_1, window_bounds = array<i64: 128, 1>}, {pipeline_mode = #tpu.pipeline_mode<synchronous>, transform_indices = @transform_2, window_bounds = array<i64: 128, 1>}, {pipeline_mode = #tpu.pipeline_mode<synchronous>, transform_indices = @transform_3, window_bounds = array<i64: 128, 128>}, {pipeline_mode = #tpu.pipeline_mode<synchronous>, transform_indices = @transform_4, window_bounds = array<i64: 128, 128>}, {transform_indices = @transform_5, window_bounds = array<i64: 4, 16, 128>}]} {
    %c0 = arith.constant 0 : index
    %c0_0 = arith.constant 0 : index
    %c0_1 = arith.constant 0 : index
    %0 = vector.load %arg1[%c0, %c0_0, %c0_1] : memref<8x16x128xbf16, #tpu.memory_space<vmem>>, vector<8x16x128xbf16>
    %1 = vector.shape_cast %0 : vector<8x16x128xbf16> to vector<128x128xbf16>
    %2 = arith.extf %1 : vector<128x128xbf16> to vector<128x128xf32>
    %c0_2 = arith.constant 0 : index
    %c0_3 = arith.constant 0 : index
    %3 = vector.load %arg2[%c0_2, %c0_3] : memref<128x1xf32, #tpu.memory_space<vmem>>, vector<128x1xf32>
    %4 = vector.broadcast %3 : vector<128x1xf32> to vector<128x128xf32>
    %5 = arith.mulf %2, %4 : vector<128x128xf32>
    %c0_4 = arith.constant 0 : index
    %c0_5 = arith.constant 0 : index
    %6 = vector.load %arg3[%c0_4, %c0_5] : memref<128x1xf32, #tpu.memory_space<vmem>>, vector<128x1xf32>
    %7 = vector.broadcast %6 : vector<128x1xf32> to vector<128x128xf32>
    %8 = arith.addf %5, %7 : vector<128x128xf32>
    %cst = arith.constant 0.000000e+00 : f32
    %9 = vector.broadcast %cst : f32 to vector<128x128xf32>
    %10 = arith.maximumf %8, %9 : vector<128x128xf32>
    %11 = arith.truncf %10 : vector<128x128xf32> to vector<128x128xbf16>
    %12 = vector.extract_strided_slice %11 {offsets = [0, 0], sizes = [64, 128], strides = [1, 1]} : vector<128x128xbf16> to vector<64x128xbf16>
    %13 = vector.extract_strided_slice %11 {offsets = [64, 0], sizes = [64, 128], strides = [1, 1]} : vector<128x128xbf16> to vector<64x128xbf16>
    %c0_6 = arith.constant 0 : index
    %c0_7 = arith.constant 0 : index
    %14 = vector.load %arg4[%c0_6, %c0_7] : memref<128x128xbf16, #tpu.memory_space<vmem>>, vector<128x128xbf16>
    %cst_8 = arith.constant dense<0.000000e+00> : vector<64x128xf32>
    %15 = tpu.matmul %12, %14, %cst_8 {dimension_numbers = #tpu.dot_dimension_numbers<[1], [0], [0], [1], [0, 0, 1, 1], [], []>} : vector<64x128xbf16>, vector<128x128xbf16>, vector<64x128xf32> -> vector<64x128xf32>
    %c0_9 = arith.constant 0 : index
    %c0_10 = arith.constant 0 : index
    %16 = vector.load %arg5[%c0_9, %c0_10] : memref<128x128xbf16, #tpu.memory_space<vmem>>, vector<128x128xbf16>
    %cst_11 = arith.constant dense<0.000000e+00> : vector<64x128xf32>
    %17 = tpu.matmul %13, %16, %cst_11 {dimension_numbers = #tpu.dot_dimension_numbers<[1], [0], [0], [1], [0, 0, 1, 1], [], []>} : vector<64x128xbf16>, vector<128x128xbf16>, vector<64x128xf32> -> vector<64x128xf32>
    %18 = arith.addf %15, %17 : vector<64x128xf32>
    %19 = vector.shape_cast %18 : vector<64x128xf32> to vector<4x16x128xf32>
    %c0_12 = arith.constant 0 : index
    %c0_13 = arith.constant 0 : index
    %c0_14 = arith.constant 0 : index
    %20 = vector.load %arg6[%c0_12, %c0_13, %c0_14] : memref<4x16x128xf32, #tpu.memory_space<vmem>>, vector<4x16x128xf32>
    tpu.vector_store %arg6[%c0_12, %c0_13, %c0_14], %19 {strides = array<i32>} : memref<4x16x128xf32, #tpu.memory_space<vmem>>, vector<4x16x128xf32>,
    return
  }
  func.func @transform_0(%arg0: i32) -> (i32, i32, i32) {
    %c0_i32 = arith.constant 0 : i32
    %c0_i32_0 = arith.constant 0 : i32
    %c0_i32_1 = arith.constant 0 : i32
    return %c0_i32, %arg0, %c0_i32_0 : i32, i32, i32
  }
  func.func @transform_1(%arg0: i32) -> (i32, i32) {
    %c0_i32 = arith.constant 0 : i32
    %c0_i32_0 = arith.constant 0 : i32
    %c0_i32_1 = arith.constant 0 : i32
    return %c0_i32, %c0_i32_0 : i32, i32
  }
  func.func @transform_2(%arg0: i32) -> (i32, i32) {
    %c0_i32 = arith.constant 0 : i32
    %c0_i32_0 = arith.constant 0 : i32
    %c0_i32_1 = arith.constant 0 : i32
    return %c0_i32, %c0_i32_0 : i32, i32
  }
  func.func @transform_3(%arg0: i32) -> (i32, i32) {
    %c0_i32 = arith.constant 0 : i32
    %c0_i32_0 = arith.constant 0 : i32
    %c0_i32_1 = arith.constant 0 : i32
    return %c0_i32, %c0_i32_0 : i32, i32
  }
  func.func @transform_4(%arg0: i32) -> (i32, i32) {
    %c0_i32 = arith.constant 0 : i32
    %c0_i32_0 = arith.constant 0 : i32
    %c0_i32_1 = arith.constant 0 : i32
    return %c0_i32, %c0_i32_0 : i32, i32
  }
  func.func @transform_5(%arg0: i32) -> (i32, i32, i32) {
    %c0_i32 = arith.constant 0 : i32
    %c0_i32_0 = arith.constant 0 : i32
    %c0_i32_1 = arith.constant 0 : i32
    return %c0_i32, %arg0, %c0_i32_0 : i32, i32, i32
  }
}

</mosaic_0001>

<bundles_post_ra>
// kernel: fourier_unit_pallas.3
= control target key start
LH: loop header
LB: loop body
LE: loop exit
PB: predicated region body
PF: predicated region fallthrough
CT: control target
= control target key end

     0   :  { %s412_s9 = smov 0   ;;  %s414_s10 = smov 0   ;;  %s465_s0 = inlined_call_operand.vmem [shape: bf16[16,4], index: 0, kind: input, shape index: {}]   ;;  %s466_s1 = inlined_call_operand.vmem [shape: bf16[4,512], index: 1, kind: input, shape index: {}]   ;;  %s467_s2 = inlined_call_operand.vmem [shape: bf16[16,512], index: 2, kind: output, shape index: {}]  }
   0x1   :  { %s416_s11 = smov 0  }
   0x2 LB: > { %s425_s12 = sadd.s32 4294967295, %s394_s11   ;;  %s427_s13 = sadd.s32 1, %s394_s11   ;;  %s394_s11 = sphi %s416_s11, %s471_s11   ;;  %s390_s10 = sphi %s414_s10, %s470_s10   ;;  %s386_s9 = sphi %s412_s9, %s469_s9  }
   0x3   : > { %s63_s14 = ssub.s32 %s394_s11, %s427_s13  ;;  %s66_s15 = sadd.s32 1, %s390_s10 }
   0x4   : > { %p64_p0 = scmp.eq.s32.totalorder %s63_s14, 0  ;;  %p76_p1 = scmp.ne.s32.totalorder %s390_s10, %s386_s9 }
   0x5   : > { %p77_p2 = scmp.eq.s32.totalorder %s425_s12, 1  ;;  %p328_p3 = scmp.ge.s32.totalorder %s394_s11, 1 }
   0x6   : > { %s435_s16 = scalar_select %p64_p0, %s390_s10, %s66_s15  }
   0x7   : > { %p437_p4 = por %p77_p2, %p76_p1  ;;  %p113_p5 = scmp.lt.s32.totalorder %s394_s11, 3 }
   0x9   : > { %p114_p6 = pnand %p328_p3, %p113_p5 }
   0xa   : > { %s330_s18 = sshll.u32 (!%p114_p6), %s425_s12, 1  ;;  %s131_s25 = sand.u32 (!%p114_p6), 1, %s386_s9  }
   0xb   : > { %117 = sbr.rel (%p114_p6) target bundleno = 236 (0xec), region = 28  ;;  %p135_p7 = scmp.lt.s32.totalorder (!%p114_p6), %s330_s18, 3 }
   0xc   : > { %s329_s26 = sshll.u32 (!%p114_p6), %s131_s25, 4 }
   0xd   : > { %s133_s27 = scalar_lea.vmem (!%p114_p6), [#allocation2], %s329_s26 }
  0x10   : > { %v396_v0 = vmov 0   ;;  %s473_s18 = smov (!%p135_p7, %s330_s18), 3  ;;  %vm163_vm0 = vcmask 1041408   ;;  %v371_v4 = vld [vmem:[%s465_s0] sm:$0xff]   ;;  %vm159_vm1 = vcmask 31744   ;;  %s345_s28 = sshll.u32 (%p437_p4), %s425_s12, 3 }
  0x11   : > { %202 = vmatprep.mubr.bf16.mxu0 %v396_v0  ;;  %s331_s19 = sshll.u32 %s473_s18, 1  ;;  %s236_s3 = scalar_lea.vmem (%p437_p4), %s467_s2, %s345_s28 }
  0x12   : > { %s138_s22 = scalar_lea.vmem %s466_s1, %s331_s19 }
  0x13   : > { %v333_v1 = vld.sshfl [vmem:[%s138_s22] sm:$0x33 pattern:$0x76325410] }
  0x14   : > { %v158_v2 = vcombine.high %v333_v1, %v333_v1  ;;  %v165_v3 = vsel %vm163_vm0, %v333_v1, 0 }
  0x16   : > { %334 = vmatprep.subr.msk.bf16.mxu0 %vm163_vm0, %v158_v2 }
  0x17   : > { %185 = vmatpush1.bf16.msra.mxu0 %v165_v3 }
  0x1a   : > { %335 = vmatmul.mubr.msk.bf16.vlgmr.msra.gmra.mxu0 %vm159_vm1, %v371_v4 }
  0xda   : > { %v204_v5 = vpop.f32.mrf.mxu0 }
  0xdc   : > { %v206_v6 = vpop.f32.mrf.mxu0 }
  0xdd   : > { %v343_v7 = vpack.c.bf16 %v206_v6, %v204_v5 }
  0xde   : > { %v208_v8 = vpop.f32.mrf.mxu0 }
  0xdf   : > { %225 = vst [vmem:[%s133_s27] sm:$0xff] %v343_v7  ;;  %233 = sbr.rel (!%p437_p4) target bundleno = 236 (0xec), region = 32 }
  0xe0   : > { %v210_v9 = vpop.f32.mrf.mxu0 }
  0xe1   : > { %v344_v10 = vpack.c.bf16 %v210_v9, %v208_v8 }
  0xe3   : > { %226 = vst [vmem:[%s133_s27 + $0x8] sm:$0xff] %v344_v10 }
  0xe6   : > { %v267_v11 = vld [vmem:[%s133_s27] sm:$0xff] }
  0xe7   : > { %268 = vst [vmem:[%s236_s3] sm:$0xff] %v267_v11 }
  0xea   : > { %v269_v12 = vld [vmem:[%s133_s27 + $0x8] sm:$0xff] }
  0xeb   : > { %270 = vst [vmem:[%s236_s3 + $0x10] sm:$0xff] %v269_v12 }
  0xec PF: > { %p9_p8 = scmp.ge.s32.totalorder %s427_s13, 4   ;;  %s469_s9 = smov %s390_s10 }
  0xed   : > { %s470_s10 = smov %s435_s16  ;;  %s471_s11 = smov %s427_s13 }
  0xee   :  { %11 = sbr.rel (!%p9_p8) target bundleno = 2 (0x2), region = 96 }

// kernel: fourier_unit_pallas.4
= control target key start
LH: loop header
LB: loop body
LE: loop exit
PB: predicated region body
PF: predicated region fallthrough
CT: control target
= control target key end

     0   :  { %s1564_s15 = smov 0   ;;  %s1566_s16 = smov 0   ;;  %s1803_s0 = inlined_call_operand.vmem [shape: bf16[16,32,16], index: 0, kind: input, shape index: {}]   ;;  %s1804_s1 = inlined_call_operand.vmem [shape: bf16[16,128], index: 1, kind: input, shape index: {}]   ;;  %s1805_s2 = inlined_call_operand.vmem [shape: bf16[16,128], index: 2, kind: input, shape index: {}]   ;;  %s1806_s3 = inlined_call_operand.vmem [shape: bf16[8,32,128], index: 3, kind: output, shape index: {0}]   ;;  %s1807_s4 = inlined_call_operand.vmem [shape: f32[8,2], index: 4, kind: output, shape index: {1}]  }
   0x1   :  { %s1568_s17 = smov 0  }
   0x2 LB: > { %s1580_s18 = sadd.s32 4294967295, %s1536_s17   ;;  %s1583_s19 = sadd.s32 1, %s1536_s17   ;;  %s1536_s17 = sphi %s1568_s17, %s1811_s17   ;;  %s1532_s16 = sphi %s1566_s16, %s1810_s16   ;;  %s1528_s15 = sphi %s1564_s15, %s1809_s15  }
   0x3   : > { %s19_s20 = ssub.s32 %s1536_s17, %s1583_s19  ;;  %s22_s21 = sadd.s32 1, %s1532_s16 }
   0x4   : > { %p20_p0 = scmp.eq.s32.totalorder %s19_s20, 0  ;;  %p29_p1 = scmp.ne.s32.totalorder %s1532_s16, %s1528_s15 }
   0x5   : > { %p30_p2 = scmp.eq.s32.totalorder %s1536_s17, 0  ;;  %p101_p3 = scmp.eq.s32.totalorder %s1580_s18, 1 }
   0x6   : > { %s1593_s22 = scalar_select %p20_p0, %s1532_s16, %s22_s21  }
   0x7   : > { %p31_p4 = por %p30_p2, %p29_p1  ;;  %p1595_p5 = por %p101_p3, %p29_p1 }
   0x8   : > { %p1289_p6 = scmp.ge.s32.totalorder %s1536_s17, 2 }
   0xa   : > { %150 = sbr.rel (%p1289_p6) target bundleno = 27 (0x1b), region = 24 }
   0xf   : > { %153 = sbr.rel (!%p31_p4) target bundleno = 27 (0x1b), region = 28  ;;  %s155_s24 = sand.u32 (%p31_p4), 1, %s1532_s16  }
  0x10   : > { %s1352_s25 = sshll.u32 (%p31_p4), %s1536_s17, 3  ;;  %s1290_s26 = sshll.u32 (%p31_p4), %s155_s24, 7 }
  0x11   : > { %s1605_s29 = scalar_lea.vmem (%p31_p4), %s1803_s0, %s1352_s25  ;;  %s157_s30 = scalar_lea.vmem (%p31_p4), [#allocation2], %s1290_s26 }
  0x12   : > { %v177_v0 = vld [vmem:[%s1605_s29] sm:$0xff] (%p31_p4)   ;;  %v181_v1 = vld [vmem:[%s1605_s29 + $0x10] sm:$0xff] (%p31_p4)  }
  0x13   : > { %v185_v2 = vld [vmem:[%s1605_s29 + $0x20] sm:$0xff] (%p31_p4)   ;;  %178 = vst [vmem:[%s157_s30] sm:$0xff] (%p31_p4), %v177_v0   ;;  %182 = vst [vmem:[%s157_s30 + $0x8] sm:$0xff] (%p31_p4), %v181_v1   ;;  %v189_v3 = vld [vmem:[%s1605_s29 + $0x30] sm:$0xff] (%p31_p4)  }
  0x14   : > { %186 = vst [vmem:[%s157_s30 + $0x10] sm:$0xff] %v185_v2   ;;  %v193_v4 = vld [vmem:[%s1605_s29 + $0x40] sm:$0xff]   ;;  %v197_v5 = vld [vmem:[%s1605_s29 + $0x50] sm:$0xff]   ;;  %190 = vst [vmem:[%s157_s30 + $0x18] sm:$0xff] %v189_v3  }
  0x15   : > { %194 = vst [vmem:[%s157_s30 + $0x20] sm:$0xff] %v193_v4   ;;  %198 = vst [vmem:[%s157_s30 + $0x28] sm:$0xff] %v197_v5   ;;  %v201_v6 = vld [vmem:[%s1605_s29 + $0x60] sm:$0xff]   ;;  %v205_v7 = vld [vmem:[%s1605_s29 + $0x70] sm:$0xff]  }
  0x16   : > { %v209_v8 = vld [vmem:[%s1605_s29 + $0x80] sm:$0xff]   ;;  %202 = vst [vmem:[%s157_s30 + $0x30] sm:$0xff] %v201_v6   ;;  %206 = vst [vmem:[%s157_s30 + $0x38] sm:$0xff] %v205_v7   ;;  %v213_v9 = vld [vmem:[%s1605_s29 + $0x90] sm:$0xff]  }
  0x17   : > { %210 = vst [vmem:[%s157_s30 + $0x40] sm:$0xff] %v209_v8   ;;  %v217_v10 = vld [vmem:[%s1605_s29 + $0xa0] sm:$0xff]   ;;  %v221_v11 = vld [vmem:[%s1605_s29 + $0xb0] sm:$0xff]   ;;  %214 = vst [vmem:[%s157_s30 + $0x48] sm:$0xff] %v213_v9  }
  0x18   : > { %218 = vst [vmem:[%s157_s30 + $0x50] sm:$0xff] %v217_v10   ;;  %222 = vst [vmem:[%s157_s30 + $0x58] sm:$0xff] %v221_v11   ;;  %v225_v12 = vld [vmem:[%s1605_s29 + $0xc0] sm:$0xff]   ;;  %v229_v13 = vld [vmem:[%s1605_s29 + $0xd0] sm:$0xff]  }
  0x19   : > { %v233_v14 = vld [vmem:[%s1605_s29 + $0xe0] sm:$0xff]   ;;  %226 = vst [vmem:[%s157_s30 + $0x60] sm:$0xff] %v225_v12   ;;  %230 = vst [vmem:[%s157_s30 + $0x68] sm:$0xff] %v229_v13   ;;  %v237_v15 = vld [vmem:[%s1605_s29 + $0xf0] sm:$0xff]  }
  0x1a   : > { %234 = vst [vmem:[%s157_s30 + $0x70] sm:$0xff] %v233_v14   ;;  %238 = vst [vmem:[%s157_s30 + $0x78] sm:$0xff] %v237_v15  }
  0x1b PF: > { %p1293_p7 = scmp.ge.s32.totalorder %s1536_s17, 1  ;;  %p327_p8 = scmp.lt.s32.totalorder %s1536_s17, 3 }
  0x1d   : > { %p328_p9 = pnand %p1293_p7, %p327_p8 }
  0x1e   : > { %s334_s7 = sand.u32 (!%p328_p9), 1, %s1528_s15   ;;  %p1346_p10 = scmp.ne.s32.totalorder (!%p328_p9), %s1580_s18, 0 }
  0x1f   : > { %331 = sbr.rel (%p328_p9) target bundleno = 593 (0x251), region = 69  ;;  %s1294_s10 = sshll.u32 (!%p328_p9), %s334_s7, 7 }
  0x20   : > { %s1634_s11 = scalar_lea.vmem (!%p328_p9), [#allocation2], %s1294_s10  ;;  %s1295_s12 = sshll.u32 (!%p328_p9), %s334_s7, 6 }
  0x21   : > { %s1670_s13 = scalar_lea.vmem (!%p328_p9), [#allocation3], %s1295_s12 }
  0x24   : > { %v1496_v16 = vld [vmem:[%s1805_s2] sm:$0xff]   ;;  %vm443_vm0 = vcmask 130048   ;;  %v1500_v20 = vld [vmem:[%s1634_s11 + $0x48] sm:$0xff]   ;;  %v1502_v22 = vld [vmem:[%s1634_s11 + $0x50] sm:$0xff]   ;;  %vm871_vm1 = vcmask 130112   ;;  %vm938_vm2 = vcmask 1042434  }
  0x25   : > { %v1497_v17 = vld [vmem:[%s1804_s1] sm:$0xff]   ;;  %1435 = vmatprep.subr.bf16.mxu0 %v1496_v16  ;;  %v1501_v21 = vld [vmem:[%s1634_s11 + $0x8] sm:$0xff]   ;;  %v1503_v23 = vld [vmem:[%s1634_s11 + $0x10] sm:$0xff]   ;;  %vm936_vm3 = vcmask 1041409   ;;  %vm940_vm4 = vcmask 1043459   ;;  %vm942_vm5 = vcmask 1044484  }
  0x26   : > { %1453 = vmatprep.subr.bf16.mxu1 %v1497_v17  ;;  %1436 = vmatpush3.bf16.msra.mxu0 %v1496_v16  ;;  %v1498_v18 = vld [vmem:[%s1634_s11 + $0x40] sm:$0xff]   ;;  %v1504_v24 = vld [vmem:[%s1634_s11 + $0x58] sm:$0xff]   ;;  %v1508_v28 = vld [vmem:[%s1634_s11 + $0x68] sm:$0xff]   ;;  %vm944_vm6 = vcmask 1045509   ;;  %vm946_vm7 = vcmask 1046534   ;;  %vm948_vm8 = vcmask 1047559  }
  0x27   : > { %1454 = vmatpush3.bf16.msra.mxu1 %v1497_v17  ;;  %v1499_v19 = vld [vmem:[%s1634_s11] sm:$0xff]   ;;  %1437 = vmatprep.mubr.msk.bf16.mxu0 %vm443_vm0, %v1498_v18  ;;  %v1505_v25 = vld [vmem:[%s1634_s11 + $0x18] sm:$0xff]   ;;  %v1509_v29 = vld [vmem:[%s1634_s11 + $0x28] sm:$0xff]   ;;  %vm1101_vm9 = vcmask 7168  }
  0x28   : > { %1455 = vmatprep.mubr.msk.bf16.mxu1 %vm443_vm0, %v1499_v19  ;;  %v1506_v26 = vld [vmem:[%s1634_s11 + $0x60] sm:$0xff]   ;;  %v1510_v30 = vld [vmem:[%s1634_s11 + $0x70] sm:$0xff]   ;;  %v1512_v32 = vld [vmem:[%s1634_s11 + $0x78] sm:$0xff]  }
  0x29   : > { %1438 = vmatmul.mubr.msk.bf16.vlgmr.msra.gmra.mxu0 %vm443_vm0, %v1500_v20  ;;  %v1507_v27 = vld [vmem:[%s1634_s11 + $0x20] sm:$0xff]   ;;  %v1511_v31 = vld [vmem:[%s1634_s11 + $0x30] sm:$0xff]   ;;  %v1513_v33 = vld [vmem:[%s1634_s11 + $0x38] sm:$0xff]  }
  0x2a   : > { %1456 = vmatmul.mubr.msk.bf16.vlgmr.msra.gmra.mxu1 %vm443_vm0, %v1501_v21  ;;  %1441 = vmatprep.mubr.msk.bf16.mxu0 %vm443_vm0, %v1502_v22 }
  0x2b   : > { %1459 = vmatprep.mubr.msk.bf16.mxu1 %vm443_vm0, %v1503_v23 }
  0x31   : > { %1442 = vmatmul.mubr.msk.bf16.gmra.mxu0 %vm443_vm0, %v1504_v24 }
  0x32   : > { %1460 = vmatmul.mubr.msk.bf16.gmra.mxu1 %vm443_vm0, %v1505_v25  ;;  %1445 = vmatprep.mubr.msk.bf16.mxu0 %vm443_vm0, %v1506_v26 }
  0x33   : > { %1463 = vmatprep.mubr.msk.bf16.mxu1 %vm443_vm0, %v1507_v27 }
  0x39   : > { %1446 = vmatmul.mubr.msk.bf16.gmra.mxu0 %vm443_vm0, %v1508_v28 }
  0x3a   : > { %1464 = vmatmul.mubr.msk.bf16.gmra.mxu1 %vm443_vm0, %v1509_v29  ;;  %1449 = vmatprep.mubr.msk.bf16.mxu0 %vm443_vm0, %v1510_v30 }
  0x3b   : > { %1467 = vmatprep.mubr.msk.bf16.mxu1 %vm443_vm0, %v1511_v31 }
  0x41   : > { %1450 = vmatmul.mubr.msk.bf16.gmra.mxu0 %vm443_vm0, %v1512_v32 }
  0x42   : > { %1468 = vmatmul.mubr.msk.bf16.gmra.mxu1 %vm443_vm0, %v1513_v33 }
  0xe9   : > { %v1439_v34 = vpop.f32.mrf.mxu0 }
  0xea   : > { %v1457_v35 = vpop.f32.mrf.mxu1 }
  0xeb   : > { %v678_v36 = vadd.f32 %v1457_v35, %v1439_v34  ;;  %v502_v37 = vpop.f32.mrf.mxu0 }
  0xec   : > { %v669_v38 = vpop.f32.mrf.mxu1 }
  0xed   : > { %v670_v39 = vadd.f32 %v669_v38, %v502_v37  ;;  %816 = vadd.xlane.f32.xlu1 %v678_v36  ;;  %v1440_v40 = vpop.f32.mrf.mxu0  ;;  %v956_v48 = vmul.f32 %v678_v36, %v678_v36 }
  0xee   : > { %v1458_v41 = vpop.f32.mrf.mxu1 }
  0xef   : > { %v681_v42 = vadd.f32 %v1458_v41, %v1440_v40  ;;  %812 = vadd.xlane.f32.xlu0 %v670_v39  ;;  %v505_v43 = vpop.f32.mrf.mxu0  ;;  %v954_v56 = vmul.f32 %v670_v39, %v670_v39 }
  0xf0   : > { %v672_v44 = vpop.f32.mrf.mxu1 }
  0xf1   : > { %v1378_v45 = vpack.c.bf16 %v681_v42, %v678_v36  ;;  %v673_v46 = vadd.f32 %v672_v44, %v505_v43  ;;  %818 = vadd.xlane.f32.xlu1 %v681_v42  ;;  %v1443_v47 = vpop.f32.mrf.mxu0  ;;  %v957_v52 = vmul.f32 %v681_v42, %v681_v42 }
  0xf2   : > { %v1461_v49 = vpop.f32.mrf.mxu1 }
  0xf3   : > { %1410 = vst [vmem:[%s1670_s13 + $0x8] sm:$0xff] %v1378_v45   ;;  %v1373_v50 = vpack.c.bf16 %v673_v46, %v670_v39  ;;  %974 = vadd.xlane.f32.xlu0 %v956_v48  ;;  %v518_v51 = vpop.f32.mrf.mxu0  ;;  %v694_v54 = vadd.f32 %v1461_v49, %v1443_v47  ;;  %v955_v61 = vmul.f32 %v673_v46, %v673_v46 }
  0xf4   : > { %v685_v53 = vpop.f32.mrf.mxu1 }
  0xf5   : > { %1374 = vst [vmem:[%s1670_s13] sm:$0xff] %v1373_v50   ;;  %976 = vadd.xlane.f32.xlu1 %v957_v52  ;;  %v1444_v55 = vpop.f32.mrf.mxu0  ;;  %v686_v58 = vadd.f32 %v685_v53, %v518_v51  ;;  %v960_v21 = vmul.f32 %v694_v54, %v694_v54 }
  0xf6   : > { %v1462_v57 = vpop.f32.mrf.mxu1 }
  0xf7   : > { %v697_v59 = vadd.f32 %v1462_v57, %v1444_v55  ;;  %970 = vadd.xlane.f32.xlu0 %v954_v56  ;;  %v521_v60 = vpop.f32.mrf.mxu0  ;;  %v958_v30 = vmul.f32 %v686_v58, %v686_v58  ;;  %v860_v57 = vlaneseq }
  0xf8   : > { %v688_v62 = vpop.f32.mrf.mxu1 }
  0xf9   : > { %v1388_v63 = vpack.c.bf16 %v697_v59, %v694_v54  ;;  %v689_v0 = vadd.f32 %v688_v62, %v521_v60  ;;  %972 = vadd.xlane.f32.xlu1 %v955_v61  ;;  %v1447_v1 = vpop.f32.mrf.mxu0  ;;  %v961_v17 = vmul.f32 %v697_v59, %v697_v59  ;;  %v861_v60 = vand.u32 127, %v860_v57 }
  0xfa   : > { %v1465_v2 = vpop.f32.mrf.mxu1 }
  0xfb   : > { %1412 = vst [vmem:[%s1670_s13 + $0x18] sm:$0xff] %v1388_v63   ;;  %v1383_v3 = vpack.c.bf16 %v689_v0, %v686_v58  ;;  %814 = vadd.xlane.f32.xlu0 %v673_v46  ;;  %v534_v4 = vpop.f32.mrf.mxu0  ;;  %v710_v6 = vadd.f32 %v1465_v2, %v1447_v1  ;;  %v959_v25 = vmul.f32 %v689_v0, %v689_v0  ;;  %v866_v62 = vadd.s32 4294967288, %v861_v60 }
  0xfc   : > { %v701_v5 = vpop.f32.mrf.mxu1 }
  0xfd   : > { %1411 = vst [vmem:[%s1670_s13 + $0x10] sm:$0xff] %v1383_v3   ;;  %826 = vadd.xlane.f32.xlu1 %v697_v59  ;;  %v1448_v7 = vpop.f32.mrf.mxu0  ;;  %v702_v9 = vadd.f32 %v701_v5, %v534_v4  ;;  %v964_v35 = vmul.f32 %v710_v6, %v710_v6 }
  0xfe   : > { %v1466_v8 = vpop.f32.mrf.mxu1 }
  0xff   : > { %824 = vadd.xlane.f32.xlu0 %v694_v54  ;;  %v713_v10 = vadd.f32 %v1466_v8, %v1448_v7  ;;  %v537_v11 = vpop.f32.mrf.mxu0  ;;  %v962_v37 = vmul.f32 %v702_v9, %v702_v9 }
 0x100   : > { %v704_v12 = vpop.f32.mrf.mxu1 }
 0x101   : > { %822 = vadd.xlane.f32.xlu1 %v689_v0  ;;  %v1398_v13 = vpack.c.bf16 %v713_v10, %v710_v6  ;;  %v705_v14 = vadd.f32 %v704_v12, %v537_v11  ;;  %v1451_v15 = vpop.f32.mrf.mxu0  ;;  %v965_v34 = vmul.f32 %v713_v10, %v713_v10  ;;  %v863_v0 = vshrl.u32 %v860_v57, 7 }
 0x102   : > { %v1469_v16 = vpop.f32.mrf.mxu1 }
 0x103   : > { %820 = vadd.xlane.f32.xlu0 %v686_v58  ;;  %1414 = vst [vmem:[%s1670_s13 + $0x28] sm:$0xff] %v1398_v13   ;;  %v1393_v18 = vpack.c.bf16 %v705_v14, %v702_v9  ;;  %v550_v19 = vpop.f32.mrf.mxu0  ;;  %v726_v22 = vadd.f32 %v1469_v16, %v1451_v15  ;;  %v963_v36 = vmul.f32 %v705_v14, %v705_v14 }
 0x104   : > { %v717_v20 = vpop.f32.mrf.mxu1  ;;  %v1690_v2 = vsub.s32 %v866_v62, %v863_v0  ;;  %v1694_v4 = vsub.s32 %v861_v60, %v863_v0 }
 0x105   : > { %984 = vadd.xlane.f32.xlu1 %v961_v17  ;;  %1413 = vst [vmem:[%s1670_s13 + $0x20] sm:$0xff] %v1393_v18   ;;  %v1452_v23 = vpop.f32.mrf.mxu0  ;;  %v718_v26 = vadd.f32 %v717_v20, %v550_v19  ;;  %v968_v41 = vmul.f32 %v726_v22, %v726_v22 }
 0x106   : > { %v1470_v24 = vpop.f32.mrf.mxu1 }
 0x107   : > { %982 = vadd.xlane.f32.xlu0 %v960_v21  ;;  %v729_v27 = vadd.f32 %v1470_v24, %v1452_v23  ;;  %v553_v28 = vpop.f32.mrf.mxu0  ;;  %v966_v39 = vmul.f32 %v718_v26, %v718_v26 }
 0x108   : > { %v720_v29 = vpop.f32.mrf.mxu1 }
 0x109   : > { %980 = vadd.xlane.f32.xlu1 %v959_v25  ;;  %v1408_v31 = vpack.c.bf16 %v729_v27, %v726_v22  ;;  %v721_v32 = vadd.f32 %v720_v29, %v553_v28  ;;  %v969_v40 = vmul.f32 %v729_v27, %v729_v27 }
 0x10b   : > { %978 = vadd.xlane.f32.xlu0 %v958_v30  ;;  %1416 = vst [vmem:[%s1670_s13 + $0x38] sm:$0xff] %v1408_v31   ;;  %v1403_v33 = vpack.c.bf16 %v721_v32, %v718_v26  ;;  %v967_v38 = vmul.f32 %v721_v32, %v721_v32 }
 0x10d   : > { %834 = vadd.xlane.f32.xlu1 %v713_v10  ;;  %1415 = vst [vmem:[%s1670_s13 + $0x30] sm:$0xff] %v1403_v33  }
 0x10f   : > { %832 = vadd.xlane.f32.xlu0 %v710_v6 }
 0x111   : > { %830 = vadd.xlane.f32.xlu1 %v705_v14 }
 0x113   : > { %828 = vadd.xlane.f32.xlu0 %v702_v9 }
 0x115   : > { %992 = vadd.xlane.f32.xlu1 %v965_v34 }
 0x117   : > { %990 = vadd.xlane.f32.xlu0 %v964_v35 }
 0x119   : > { %988 = vadd.xlane.f32.xlu1 %v963_v36 }
 0x11b   : > { %986 = vadd.xlane.f32.xlu0 %v962_v37 }
 0x11d   : > { %842 = vadd.xlane.f32.xlu1 %v729_v27 }
 0x11f   : > { %840 = vadd.xlane.f32.xlu0 %v726_v22 }
 0x121   : > { %838 = vadd.xlane.f32.xlu1 %v721_v32 }
 0x123   : > { %836 = vadd.xlane.f32.xlu0 %v718_v26 }
 0x125   : > { %996 = vadd.xlane.f32.xlu1 %v967_v38 }
 0x127   : > { %994 = vadd.xlane.f32.xlu0 %v966_v39 }
 0x129   : > { %1000 = vadd.xlane.f32.xlu1 %v969_v40 }
 0x12b   : > { %998 = vadd.xlane.f32.xlu0 %v968_v41 }
 0x176   : > { %v817_v42 = vpop.xlane.xlu1 %816 }
 0x177   : > { %v876_v12 = vrot.slane %v817_v42, %v1694_v4 }
 0x178   : > { %v813_v43 = vpop.xlane.xlu0 %812 }
 0x179   : > { %v865_v8 = vrot.slane %v813_v43, %v1694_v4 }
 0x17a   : > { %v819_v44 = vpop.xlane.xlu1 %818 }
 0x17b   : > { %v880_v9 = vrot.slane %v819_v44, %v1690_v2 }
 0x17c   : > { %v1680_v45 = vpop.xlane.xlu0 %974 }
 0x17d   : > { %v881_v17 = vsel %vm871_vm1, %v880_v9, %v876_v12  ;;  %v1030_v34 = vrot.slane %v1680_v45, %v1694_v4 }
 0x17e   : > { %v1682_v46 = vpop.xlane.xlu1 %976 }
 0x17f   : > { %v1034_v27 = vrot.slane %v1682_v46, %v1690_v2 }
 0x180   : > { %v971_v47 = vpop.xlane.xlu0 %970 }
 0x181   : > { %v1021_v28 = vrot.slane %v971_v47, %v1694_v4  ;;  %v1035_v43 = vsel %vm871_vm1, %v1034_v27, %v1030_v34 }
 0x182   : > { %v973_v48 = vpop.xlane.xlu1 %972 }
 0x183   : > { %v1025_v20 = vrot.slane %v973_v48, %v1690_v2 }
 0x184   : > { %v815_v49 = vpop.xlane.xlu0 %814 }
 0x185   : > { %v870_v5 = vrot.slane %v815_v49, %v1690_v2  ;;  %v1026_v35 = vsel %vm871_vm1, %v1025_v20, %v1021_v28 }
 0x186   : > { %v827_v50 = vpop.xlane.xlu1 %826  ;;  %v1090_v47 = vsel %vm936_vm3, %v1035_v43, %v1026_v35 }
 0x187   : > { %v872_v13 = vsel %vm871_vm1, %v870_v5, %v865_v8  ;;  %v898_v24 = vrot.slane %v827_v50, %v1690_v2 }
 0x188   : > { %v825_v51 = vpop.xlane.xlu0 %824  ;;  %v937_v21 = vsel %vm936_vm3, %v881_v17, %v872_v13 }
 0x189   : > { %v894_v18 = vrot.slane %v825_v51, %v1694_v4 }
 0x18a   : > { %v823_v52 = vpop.xlane.xlu1 %822 }
 0x18b   : > { %v889_v11 = vrot.slane %v823_v52, %v1690_v2  ;;  %v899_v31 = vsel %vm871_vm1, %v898_v24, %v894_v18 }
 0x18c   : > { %v821_v53 = vpop.xlane.xlu0 %820 }
 0x18d   : > { %v885_v7 = vrot.slane %v821_v53, %v1694_v4 }
 0x18e   : > { %v1684_v54 = vpop.xlane.xlu1 %984 }
 0x18f   : > { %v890_v15 = vsel %vm871_vm1, %v889_v11, %v885_v7  ;;  %v1052_v52 = vrot.slane %v1684_v54, %v1690_v2 }
 0x190   : > { %v1686_v55 = vpop.xlane.xlu0 %982  ;;  %v939_v25 = vsel %vm938_vm2, %v890_v15, %v937_v21 }
 0x191   : > { %v941_v37 = vsel %vm940_vm4, %v899_v31, %v939_v25  ;;  %v1048_v44 = vrot.slane %v1686_v55, %v1694_v4 }
 0x192   : > { %v981_v56 = vpop.xlane.xlu1 %980 }
 0x193   : > { %v1043_v29 = vrot.slane %v981_v56, %v1690_v2 }
 0x194   : > { %v979_v58 = vpop.xlane.xlu0 %978 }
 0x195   : > { %v1039_v22 = vrot.slane %v979_v58, %v1694_v4 }
 0x196   : > { %v1688_v59 = vpop.xlane.xlu1 %834 }
 0x197   : > { %v1044_v36 = vsel %vm871_vm1, %v1043_v29, %v1039_v22  ;;  %v916_v38 = vrot.slane %v1688_v59, %v1690_v2 }
 0x198   : > { %v833_v61 = vpop.xlane.xlu0 %832  ;;  %v1091_v53 = vsel %vm938_vm2, %v1044_v36, %v1090_v47 }
 0x199   : > { %v912_v32 = vrot.slane %v833_v61, %v1694_v4  ;;  %v1053_v61 = vsel %vm871_vm1, %v1052_v52, %v1048_v44 }
 0x19a   : > { %v831_v63 = vpop.xlane.xlu1 %830  ;;  %v1092_v0 = vsel %vm940_vm4, %v1053_v61, %v1091_v53 }
 0x19b   : > { %v907_v23 = vrot.slane %v831_v63, %v1690_v2  ;;  %v917_v48 = vsel %vm871_vm1, %v916_v38, %v912_v32 }
 0x19c   : > { %v829_v1 = vpop.xlane.xlu0 %828 }
 0x19d   : > { %v903_v16 = vrot.slane %v829_v1, %v1694_v4 }
 0x19e   : > { %v1692_v3 = vpop.xlane.xlu1 %992 }
 0x19f   : > { %v908_v30 = vsel %vm871_vm1, %v907_v23, %v903_v16  ;;  %v1070_v8 = vrot.slane %v1692_v3, %v1690_v2 }
 0x1a0   : > { %v1697_v6 = vpop.xlane.xlu0 %990  ;;  %v943_v39 = vsel %vm942_vm5, %v908_v30, %v941_v37 }
 0x1a1   : > { %v945_v56 = vsel %vm944_vm6, %v917_v48, %v943_v39  ;;  %v1066_v62 = vrot.slane %v1697_v6, %v1694_v4 }
 0x1a2   : > { %v989_v10 = vpop.xlane.xlu1 %988 }
 0x1a3   : > { %v1061_v49 = vrot.slane %v989_v10, %v1690_v2  ;;  %v1071_v11 = vsel %vm871_vm1, %v1070_v8, %v1066_v62 }
 0x1a4   : > { %v987_v14 = vpop.xlane.xlu0 %986 }
 0x1a5   : > { %v1057_v40 = vrot.slane %v987_v14, %v1694_v4 }
 0x1a6   : > { %v843_v19 = vpop.xlane.xlu1 %842 }
 0x1a7   : > { %v934_v50 = vrot.slane %v843_v19, %v1690_v2  ;;  %v1062_v57 = vsel %vm871_vm1, %v1061_v49, %v1057_v40 }
 0x1a8   : > { %v841_v26 = vpop.xlane.xlu0 %840  ;;  %v1093_v9 = vsel %vm942_vm5, %v1062_v57, %v1092_v0 }
 0x1a9   : > { %v930_v41 = vrot.slane %v841_v26, %v1694_v4  ;;  %v1094_v14 = vsel %vm944_vm6, %v1071_v11, %v1093_v9 }
 0x1aa   : > { %v839_v33 = vpop.xlane.xlu1 %838 }
 0x1ab   : > { %v925_v45 = vrot.slane %v839_v33, %v1690_v2  ;;  %v935_v59 = vsel %vm871_vm1, %v934_v50, %v930_v41 }
 0x1ac   : > { %v837_v42 = vpop.xlane.xlu0 %836 }
 0x1ad   : > { %v921_v46 = vrot.slane %v837_v42, %v1694_v4 }
 0x1ae   : > { %v997_v51 = vpop.xlane.xlu1 %996 }
 0x1af   : > { %v926_v55 = vsel %vm871_vm1, %v925_v45, %v921_v46  ;;  %v1079_v1 = vrot.slane %v997_v51, %v1690_v2 }
 0x1b0   : > { %v995_v58 = vpop.xlane.xlu0 %994  ;;  %v947_v60 = vsel %vm946_vm7, %v926_v55, %v945_v56 }
 0x1b1   : > { %v1075_v54 = vrot.slane %v995_v58, %v1694_v4  ;;  %v949_v63 = vsel %vm948_vm8, %v935_v59, %v947_v60 }
 0x1b2   : > { %v1001_v5 = vpop.xlane.xlu1 %1000  ;;  %v951_v7 = vsel %vm443_vm0, %v949_v63, 0.0 }
 0x1b3   : > { %952 = vadd.xlane.f32.xlu0 %v951_v7  ;;  %v1080_v10 = vsel %vm871_vm1, %v1079_v1, %v1075_v54  ;;  %v1088_v12 = vrot.slane %v1001_v5, %v1690_v2 }
 0x1b4   : > { %v999_v6 = vpop.xlane.xlu0 %998  ;;  %v1095_v16 = vsel %vm946_vm7, %v1080_v10, %v1094_v14 }
 0x1b5   : > { %v1084_v13 = vrot.slane %v999_v6, %v1694_v4 }
 0x1b7   : > { %v1089_v15 = vsel %vm871_vm1, %v1088_v12, %v1084_v13 }
 0x1b8   : > { %v1096_v3 = vsel %vm948_vm8, %v1089_v15, %v1095_v16 }
 0x1b9   : > { %v1098_v17 = vsel %vm443_vm0, %v1096_v3, 0.0 }
 0x1ba   : > { %1099 = vadd.xlane.f32.xlu1 %v1098_v17 }
 0x23c   : > { %v953_v18 = vpop.xlane.xlu0 %952 }
 0x240   : > { %1106 = sbr.rel (%p1346_p10) target bundleno = 583 (0x247), region = 77 }
 0x243   : > { %v1100_v19 = vpop.xlane.xlu1 %1099 }
 0x244   : > { %v1102_v20 = vsel %vm1101_vm9, %v953_v18, %v1100_v19 }
 0x245   : > { %vm1107_vm10 = vcmask 15360   ;;  %v1538_v2 = vmov 0.0  }
 0x246   : > { %1108 = vst.msk [vmem:[%s1807_s4] sm:$0xff] %vm1107_vm10, %v1538_v2 }
 0x247 PF: > { %vm1111_vm11 = vcmask 15360   ;;  %s1369_s25 = sshll.u32 (%p1595_p5), %s1580_s18, 3  ;;  %v1139_v22 = vld [vmem:[%s1670_s13] sm:$0xff] (%p1595_p5)   ;;  %v1143_v23 = vld [vmem:[%s1670_s13 + $0x8] sm:$0xff] (%p1595_p5)   ;;  %v1147_v24 = vld [vmem:[%s1670_s13 + $0x10] sm:$0xff] (%p1595_p5)  }
 0x248   : > { %s1122_s28 = scalar_lea.vmem (%p1595_p5), %s1806_s3, %s1369_s25  ;;  %v1151_v25 = vld [vmem:[%s1670_s13 + $0x18] sm:$0xff] (%p1595_p5)   ;;  %v1155_v26 = vld [vmem:[%s1670_s13 + $0x20] sm:$0xff] (%p1595_p5)   ;;  %v1159_v27 = vld [vmem:[%s1670_s13 + $0x28] sm:$0xff] (%p1595_p5)  }
 0x249   : > { %1140 = vst [vmem:[%s1122_s28] sm:$0xff] (%p1595_p5), %v1139_v22   ;;  %1144 = vst [vmem:[%s1122_s28 + $0x10] sm:$0xff] (%p1595_p5), %v1143_v23   ;;  %v1163_v28 = vld [vmem:[%s1670_s13 + $0x30] sm:$0xff] (%p1595_p5)   ;;  %v1167_v29 = vld [vmem:[%s1670_s13 + $0x38] sm:$0xff] (%p1595_p5)  }
 0x24a   : > { %1148 = vst [vmem:[%s1122_s28 + $0x20] sm:$0xff] (%p1595_p5), %v1147_v24   ;;  %1152 = vst [vmem:[%s1122_s28 + $0x30] sm:$0xff] (%p1595_p5), %v1151_v25  }
 0x24b   : > { %1156 = vst [vmem:[%s1122_s28 + $0x40] sm:$0xff] (%p1595_p5), %v1155_v26   ;;  %1160 = vst [vmem:[%s1122_s28 + $0x50] sm:$0xff] (%p1595_p5), %v1159_v27  }
 0x24c   : > { %1119 = sbr.rel (!%p1595_p5) target bundleno = 593 (0x251), region = 81  ;;  %1164 = vst [vmem:[%s1122_s28 + $0x60] sm:$0xff] (%p1595_p5), %v1163_v28   ;;  %1168 = vst [vmem:[%s1122_s28 + $0x70] sm:$0xff] (%p1595_p5), %v1167_v29  }
 0x24d   : > { %v1109_v4 = vld [vmem:[%s1807_s4] sm:$0xff] }
 0x24e   : > { %v1110_v21 = vadd.f32 %v1109_v4, %v1102_v20 }
 0x250   : > { %1112 = vst.msk [vmem:[%s1807_s4] sm:$0xff] %vm1111_vm11, %v1110_v21 }
 0x251 PF: > { %p12_p11 = scmp.ge.s32.totalorder %s1583_s19, 4   ;;  %s1809_s15 = smov %s1532_s16 }
 0x252   : > { %s1810_s16 = smov %s1593_s22  ;;  %s1811_s17 = smov %s1583_s19 }
 0x253   :  { %14 = sbr.rel (!%p12_p11) target bundleno = 2 (0x2), region = 161 }

// kernel: fourier_unit_pallas.5
= control target key start
LH: loop header
LB: loop body
LE: loop exit
PB: predicated region body
PF: predicated region fallthrough
CT: control target
= control target key end

     0   :  { %s1241_s18 = smov 0   ;;  %s1243_s19 = smov 0   ;;  %s1477_s0 = inlined_call_operand.vmem [shape: bf16[8,32,128], index: 0, kind: input, shape index: {}]   ;;  %s1478_s1 = inlined_call_operand.vmem [shape: f32[128,1], index: 1, kind: input, shape index: {}]   ;;  %s1479_s2 = inlined_call_operand.vmem [shape: f32[128,1], index: 2, kind: input, shape index: {}]   ;;  %s1480_s3 = inlined_call_operand.vmem [shape: bf16[128,128], index: 3, kind: input, shape index: {}]   ;;  %s1481_s4 = inlined_call_operand.vmem [shape: bf16[128,128], index: 4, kind: input, shape index: {}]   ;;  %s1482_s5 = inlined_call_operand.vmem [shape: f32[4,32,128], index: 5, kind: output, shape index: {}]  }
   0x1   :  { %s1245_s20 = smov 0  }
   0x2 LB: > { %s999_s21 = sadd.s32 4294967295, %s1208_s20   ;;  %s1258_s22 = sadd.s32 1, %s1208_s20   ;;  %s1208_s20 = sphi %s1245_s20, %s1486_s20   ;;  %s1204_s19 = sphi %s1243_s19, %s1485_s19   ;;  %s1200_s18 = sphi %s1241_s18, %s1484_s18  }
   0x3   : > { %s19_s23 = ssub.s32 %s1208_s20, %s1258_s22  ;;  %s22_s24 = sadd.s32 1, %s1204_s19 }
   0x4   : > { %p20_p0 = scmp.eq.s32.totalorder %s19_s23, 0  ;;  %p29_p1 = scmp.ne.s32.totalorder %s1204_s19, %s1200_s18 }
   0x5   : > { %p30_p2 = scmp.eq.s32.totalorder %s1208_s20, 0  ;;  %p143_p3 = scmp.eq.s32.totalorder %s999_s21, 1 }
   0x6   : > { %s1269_s25 = scalar_select %p20_p0, %s1204_s19, %s22_s24  }
   0x7   : > { %p31_p4 = por %p30_p2, %p29_p1  ;;  %p1271_p5 = por %p143_p3, %p29_p1 }
   0x8   : > { %p1002_p6 = scmp.ge.s32.totalorder %s1208_s20, 2 }
   0xa   : > { %177 = sbr.rel (%p1002_p6) target bundleno = 23 (0x17), region = 32 }
   0xf   : > { %180 = sbr.rel (!%p31_p4) target bundleno = 23 (0x17), region = 36  ;;  %s182_s27 = sand.u32 (%p31_p4), 1, %s1204_s19  }
  0x10   : > { %s1030_s28 = sshll.u32 (%p31_p4), %s1208_s20, 3  ;;  %s1003_s29 = sshll.u32 (%p31_p4), %s182_s27, 6 }
  0x11   : > { %s187_s7 = scalar_lea.vmem (%p31_p4), %s1477_s0, %s1030_s28  ;;  %s184_s8 = scalar_lea.vmem (%p31_p4), [#allocation2], %s1003_s29 }
  0x12   : > { %v204_v0 = vld [vmem:[%s187_s7] sm:$0xff] (%p31_p4)   ;;  %v208_v1 = vld [vmem:[%s187_s7 + $0x10] sm:$0xff] (%p31_p4)  }
  0x13   : > { %v212_v2 = vld [vmem:[%s187_s7 + $0x20] sm:$0xff] (%p31_p4)   ;;  %205 = vst [vmem:[%s184_s8] sm:$0xff] (%p31_p4), %v204_v0   ;;  %209 = vst [vmem:[%s184_s8 + $0x8] sm:$0xff] (%p31_p4), %v208_v1   ;;  %v216_v3 = vld [vmem:[%s187_s7 + $0x30] sm:$0xff] (%p31_p4)  }
  0x14   : > { %213 = vst [vmem:[%s184_s8 + $0x10] sm:$0xff] %v212_v2   ;;  %v220_v4 = vld [vmem:[%s187_s7 + $0x40] sm:$0xff]   ;;  %v224_v5 = vld [vmem:[%s187_s7 + $0x50] sm:$0xff]   ;;  %217 = vst [vmem:[%s184_s8 + $0x18] sm:$0xff] %v216_v3  }
  0x15   : > { %221 = vst [vmem:[%s184_s8 + $0x20] sm:$0xff] %v220_v4   ;;  %225 = vst [vmem:[%s184_s8 + $0x28] sm:$0xff] %v224_v5   ;;  %v228_v6 = vld [vmem:[%s187_s7 + $0x60] sm:$0xff]   ;;  %v232_v7 = vld [vmem:[%s187_s7 + $0x70] sm:$0xff]  }
  0x16   : > { %229 = vst [vmem:[%s184_s8 + $0x30] sm:$0xff] %v228_v6   ;;  %233 = vst [vmem:[%s184_s8 + $0x38] sm:$0xff] %v232_v7  }
  0x17 PF: > { %p1006_p7 = scmp.ge.s32.totalorder %s1208_s20, 1  ;;  %p290_p8 = scmp.lt.s32.totalorder %s1208_s20, 3 }
  0x19   : > { %p291_p9 = pnand %p1006_p7, %p290_p8 }
  0x1a   : > { %s297_s15 = sand.u32 (!%p291_p9), 1, %s1200_s18  }
  0x1b   : > { %294 = sbr.rel (%p291_p9) target bundleno = 434 (0x1b2), region = 77  ;;  %s1428_s16 = sshll.u32 (!%p291_p9), %s297_s15, 6 }
  0x1c   : > { %s1431_s17 = scalar_lea.vmem (!%p291_p9), [#allocation2], %s1428_s16  ;;  %s1442_s18 = scalar_lea.vmem (!%p291_p9), [#allocation3], %s1428_s16 }
  0x20   : > { %v366_v8 = vld [vmem:[%s1478_s1 + $0x40] sm:$0xff]  ;;  %v1210_v10 = vmov 0   ;;  %v367_v11 = vld [vmem:[%s1478_s1 + $0x48] sm:$0xff]  ;;  %v361_v13 = vld [vmem:[%s1478_s1 + $0x18] sm:$0xff]  ;;  %s1031_s23 = sshll.u32 (%p1271_p5), %s999_s21, 4 }
  0x21   : > { %v358_v9 = vld [vmem:[%s1478_s1] sm:$0xff]  ;;  %1169 = vset.pattern.permute.xlu1 %v1210_v10  ;;  %1168 = vset.pattern.permute.xlu0 %v1210_v10  ;;  %v359_v12 = vld [vmem:[%s1478_s1 + $0x8] sm:$0xff]  ;;  %v360_v14 = vld [vmem:[%s1478_s1 + $0x10] sm:$0xff]  ;;  %s881_s28 = scalar_lea.vmem (%p1271_p5), %s1482_s5, %s1031_s23 }
  0x22   : > { %416 = vperm.xlu1 %1169, %v366_v8   ;;  %376 = vperm.xlu0 %1168, %v358_v9   ;;  %v369_v15 = vld [vmem:[%s1478_s1 + $0x58] sm:$0xff]  ;;  %v368_v16 = vld [vmem:[%s1478_s1 + $0x50] sm:$0xff]  ;;  %v471_v18 = vld [vmem:[%s1479_s2 + $0x8] sm:$0xff] }
  0x23   : > { %v1170_v17 = vld [vmem:[%s1480_s3 + $0x38] sm:$0xff]   ;;  %v470_v19 = vld [vmem:[%s1479_s2] sm:$0xff]  ;;  %v1172_v21 = vld [vmem:[%s1480_s3 + $0x30] sm:$0xff]  }
  0x24   : > { %1119 = vmatprep.subr.bf16.mxu1 %v1170_v17  ;;  %v1171_v20 = vld [vmem:[%s1481_s4 + $0x38] sm:$0xff]   ;;  %v1173_v22 = vld [vmem:[%s1481_s4 + $0x30] sm:$0xff]   ;;  %v1174_v23 = vld [vmem:[%s1480_s3 + $0x28] sm:$0xff]  }
  0x25   : > { %1120 = vmatpush3.bf16.msra.mxu1 %v1170_v17  ;;  %1095 = vmatprep.subr.bf16.mxu0 %v1171_v20  ;;  %v1175_v24 = vld [vmem:[%s1481_s4 + $0x28] sm:$0xff]   ;;  %v478_v26 = vld [vmem:[%s1479_s2 + $0x40] sm:$0xff]  ;;  %v473_v29 = vld [vmem:[%s1479_s2 + $0x18] sm:$0xff] }
  0x26   : > { %421 = vperm.xlu1 %1169, %v367_v11   ;;  %381 = vperm.xlu0 %1168, %v359_v12   ;;  %v479_v25 = vld [vmem:[%s1479_s2 + $0x48] sm:$0xff]  ;;  %v1176_v27 = vld [vmem:[%s1480_s3 + $0x20] sm:$0xff]   ;;  %v472_v30 = vld [vmem:[%s1479_s2 + $0x10] sm:$0xff] }
  0x27   : > { %1121 = vmatprep.subr.bf16.mxu1 %v1172_v21  ;;  %1096 = vmatpush3.bf16.msra.mxu0 %v1171_v20  ;;  %v1177_v28 = vld [vmem:[%s1481_s4 + $0x20] sm:$0xff]   ;;  %v1178_v31 = vld [vmem:[%s1480_s3 + $0x18] sm:$0xff]   ;;  %v480_v34 = vld [vmem:[%s1479_s2 + $0x50] sm:$0xff] }
  0x28   : > { %1097 = vmatprep.subr.bf16.mxu0 %v1173_v22  ;;  %v1179_v32 = vld [vmem:[%s1481_s4 + $0x18] sm:$0xff]   ;;  %v1180_v35 = vld [vmem:[%s1480_s3 + $0x10] sm:$0xff]   ;;  %v363_v37 = vld [vmem:[%s1478_s1 + $0x28] sm:$0xff] }
  0x29   : > { %1122 = vmatpush3.bf16.msra.mxu1 %v1172_v21  ;;  %v481_v33 = vld [vmem:[%s1479_s2 + $0x58] sm:$0xff]  ;;  %v1181_v36 = vld [vmem:[%s1481_s4 + $0x10] sm:$0xff]   ;;  %v362_v38 = vld [vmem:[%s1478_s1 + $0x20] sm:$0xff] }
  0x2a   : > { %391 = vperm.xlu1 %1169, %v361_v13   ;;  %386 = vperm.xlu0 %1168, %v360_v14   ;;  %v1182_v39 = vld [vmem:[%s1480_s3 + $0x8] sm:$0xff]   ;;  %v370_v42 = vld [vmem:[%s1478_s1 + $0x60] sm:$0xff]  ;;  %v365_v45 = vld [vmem:[%s1478_s1 + $0x38] sm:$0xff] }
  0x2b   : > { %1123 = vmatprep.subr.bf16.mxu1 %v1174_v23  ;;  %1098 = vmatpush3.bf16.msra.mxu0 %v1173_v22  ;;  %v1183_v40 = vld [vmem:[%s1481_s4 + $0x8] sm:$0xff]   ;;  %v1184_v43 = vld [vmem:[%s1480_s3] sm:$0xff]   ;;  %v364_v46 = vld [vmem:[%s1478_s1 + $0x30] sm:$0xff] }
  0x2c   : > { %1099 = vmatprep.subr.bf16.mxu0 %v1175_v24  ;;  %v371_v41 = vld [vmem:[%s1478_s1 + $0x68] sm:$0xff]  ;;  %v1185_v44 = vld [vmem:[%s1481_s4] sm:$0xff]   ;;  %v373_v47 = vld [vmem:[%s1478_s1 + $0x78] sm:$0xff] }
  0x2d   : > { %1124 = vmatpush3.bf16.msra.mxu1 %v1174_v23  ;;  %v372_v48 = vld [vmem:[%s1478_s1 + $0x70] sm:$0xff]  ;;  %v475_v49 = vld [vmem:[%s1479_s2 + $0x28] sm:$0xff]  ;;  %v474_v50 = vld [vmem:[%s1479_s2 + $0x20] sm:$0xff] }
  0x2e   : > { %431 = vperm.xlu1 %1169, %v369_v15   ;;  %426 = vperm.xlu0 %1168, %v368_v16   ;;  %v483_v51 = vld [vmem:[%s1479_s2 + $0x68] sm:$0xff]  ;;  %v482_v52 = vld [vmem:[%s1479_s2 + $0x60] sm:$0xff]  ;;  %v477_v53 = vld [vmem:[%s1479_s2 + $0x38] sm:$0xff] }
  0x2f   : > { %1125 = vmatprep.subr.bf16.mxu1 %v1176_v27  ;;  %1100 = vmatpush3.bf16.msra.mxu0 %v1175_v24  ;;  %v476_v54 = vld [vmem:[%s1479_s2 + $0x30] sm:$0xff]  ;;  %v485_v55 = vld [vmem:[%s1479_s2 + $0x78] sm:$0xff]  ;;  %v1033_v61 = vld [vmem:[%s1431_s17] sm:$0xff]  }
  0x30   : > { %1101 = vmatprep.subr.bf16.mxu0 %v1177_v28  ;;  %v484_v56 = vld [vmem:[%s1479_s2 + $0x70] sm:$0xff]  ;;  %v1034_v0 = vunpack.c.l.bf16 %v1033_v61  ;;  %v1035_v1 = vunpack.c.h.bf16 %v1033_v61  ;;  %v1067_v2 = vld [vmem:[%s1431_s17 + $0x20] sm:$0xff]   ;;  %v1064_v9 = vld [vmem:[%s1431_s17 + $0x8] sm:$0xff]  }
  0x31   : > { %1126 = vmatpush3.bf16.msra.mxu1 %v1176_v27  ;;  %v1050_v5 = vunpack.c.l.bf16 %v1067_v2  ;;  %v1051_v7 = vunpack.c.h.bf16 %v1067_v2  ;;  %v1039_v14 = vunpack.c.h.bf16 %v1064_v9  ;;  %v1038_v15 = vunpack.c.l.bf16 %v1064_v9 }
  0x32   : > { %493 = vperm.xlu1 %1169, %v471_v18   ;;  %488 = vperm.xlu0 %1168, %v470_v19   ;;  %v1068_v18 = vld [vmem:[%s1431_s17 + $0x28] sm:$0xff]  }
  0x33   : > { %1127 = vmatprep.subr.bf16.mxu1 %v1178_v31  ;;  %1102 = vmatpush3.bf16.msra.mxu0 %v1177_v28  ;;  %v1054_v27 = vunpack.c.l.bf16 %v1068_v18 }
  0x34   : > { %1103 = vmatprep.subr.bf16.mxu0 %v1179_v32 }
  0x35   : > { %1128 = vmatpush3.bf16.msra.mxu1 %v1178_v31 }
  0x36   : > { %533 = vperm.xlu1 %1169, %v479_v25   ;;  %528 = vperm.xlu0 %1168, %v478_v26   ;;  %v1055_v26 = vunpack.c.h.bf16 %v1068_v18 }
  0x37   : > { %1129 = vmatprep.subr.bf16.mxu1 %v1180_v35  ;;  %1104 = vmatpush3.bf16.msra.mxu0 %v1179_v32 }
  0x38   : > { %1105 = vmatprep.subr.bf16.mxu0 %v1181_v36 }
  0x39   : > { %1130 = vmatpush3.bf16.msra.mxu1 %v1180_v35 }
  0x3a   : > { %503 = vperm.xlu1 %1169, %v473_v29   ;;  %498 = vperm.xlu0 %1168, %v472_v30  }
  0x3b   : > { %1131 = vmatprep.subr.bf16.mxu1 %v1182_v39  ;;  %1106 = vmatpush3.bf16.msra.mxu0 %v1181_v36 }
  0x3c   : > { %1107 = vmatprep.subr.bf16.mxu0 %v1183_v40 }
  0x3d   : > { %1132 = vmatpush3.bf16.msra.mxu1 %v1182_v39 }
  0x3e   : > { %543 = vperm.xlu1 %1169, %v481_v33   ;;  %538 = vperm.xlu0 %1168, %v480_v34  }
  0x3f   : > { %1133 = vmatprep.subr.bf16.mxu1 %v1184_v43  ;;  %1108 = vmatpush3.bf16.msra.mxu0 %v1183_v40 }
  0x40   : > { %1109 = vmatprep.subr.bf16.mxu0 %v1185_v44 }
  0x41   : > { %1134 = vmatpush3.bf16.msra.mxu1 %v1184_v43 }
  0x42   : > { %401 = vperm.xlu1 %1169, %v363_v37   ;;  %396 = vperm.xlu0 %1168, %v362_v38  }
  0x43   : > { %1110 = vmatpush3.bf16.msra.mxu0 %v1185_v44 }
  0x46   : > { %441 = vperm.xlu1 %1169, %v371_v41   ;;  %436 = vperm.xlu0 %1168, %v370_v42  }
  0x4a   : > { %411 = vperm.xlu1 %1169, %v365_v45   ;;  %406 = vperm.xlu0 %1168, %v364_v46  }
  0x4e   : > { %451 = vperm.xlu1 %1169, %v373_v47   ;;  %446 = vperm.xlu0 %1168, %v372_v48  }
  0x52   : > { %513 = vperm.xlu1 %1169, %v475_v49   ;;  %508 = vperm.xlu0 %1168, %v474_v50  }
  0x56   : > { %553 = vperm.xlu1 %1169, %v483_v51   ;;  %548 = vperm.xlu0 %1168, %v482_v52  }
  0x5a   : > { %523 = vperm.xlu1 %1169, %v477_v53   ;;  %518 = vperm.xlu0 %1168, %v476_v54   ;;  %v1065_v53 = vld [vmem:[%s1431_s17 + $0x10] sm:$0xff]  }
  0x5e   : > { %563 = vperm.xlu1 %1169, %v485_v55   ;;  %558 = vperm.xlu0 %1168, %v484_v56   ;;  %v1043_v56 = vunpack.c.h.bf16 %v1065_v53 }
  0x9d   : > { %v417_v57 = vpop.permute.xlu1 %416  ;;  %v377_v58 = vpop.permute.xlu0 %376 }
  0x9e   : > { %v454_v6 = vmul.f32 %v1034_v0, %v377_v58  ;;  %v462_v16 = vmul.f32 %v1050_v5, %v417_v57  ;;  %v1042_v57 = vunpack.c.l.bf16 %v1065_v53  ;;  %v1069_v58 = vld [vmem:[%s1431_s17 + $0x30] sm:$0xff]  }
  0x9f   : > { %v1058_v0 = vunpack.c.l.bf16 %v1069_v58 }
  0xa1   : > { %v422_v59 = vpop.permute.xlu1 %421  ;;  %v382_v60 = vpop.permute.xlu0 %381 }
  0xa2   : > { %v455_v8 = vmul.f32 %v1035_v1, %v382_v60  ;;  %v463_v17 = vmul.f32 %v1051_v7, %v422_v59  ;;  %v1066_v1 = vld [vmem:[%s1431_s17 + $0x18] sm:$0xff]  }
  0xa3   : > { %v1046_v7 = vunpack.c.l.bf16 %v1066_v1 }
  0xa5   : > { %v392_v62 = vpop.permute.xlu1 %391  ;;  %v387_v63 = vpop.permute.xlu0 %386 }
  0xa6   : > { %v457_v28 = vmul.f32 %v1039_v14, %v392_v62  ;;  %v456_v29 = vmul.f32 %v1038_v15, %v387_v63  ;;  %v1059_v63 = vunpack.c.h.bf16 %v1069_v58 }
  0xa9   : > { %v432_v3 = vpop.permute.xlu1 %431  ;;  %v427_v4 = vpop.permute.xlu0 %426 }
  0xaa   : > { %v465_v37 = vmul.f32 %v1055_v26, %v432_v3  ;;  %v464_v38 = vmul.f32 %v1054_v27, %v427_v4 }
  0xad   : > { %v494_v10 = vpop.permute.xlu1 %493  ;;  %v489_v11 = vpop.permute.xlu0 %488 }
  0xae   : > { %v567_v12 = vadd.f32 %v494_v10, %v455_v8  ;;  %v566_v13 = vadd.f32 %v489_v11, %v454_v6  ;;  %v1047_v6 = vunpack.c.h.bf16 %v1066_v1  ;;  %v1070_v10 = vld [vmem:[%s1431_s17 + $0x38] sm:$0xff]  }
  0xaf   : > { %v1063_v18 = vunpack.c.h.bf16 %v1070_v10 }
  0xb0   : > { %v583_v19 = vmax.f32 %v567_v12, 0.0  ;;  %v582_v20 = vmax.f32 %v566_v13, 0.0 }
  0xb1   : > { %v534_v21 = vpop.permute.xlu1 %533  ;;  %v529_v22 = vpop.permute.xlu0 %528 }
  0xb2   : > { %v575_v23 = vadd.f32 %v534_v21, %v463_v17  ;;  %v574_v24 = vadd.f32 %v529_v22, %v462_v16  ;;  %v598_v25 = vpack.c.bf16 %v583_v19, %v582_v20  ;;  %v1062_v19 = vunpack.c.l.bf16 %v1070_v10 }
  0xb4   : > { %v591_v30 = vmax.f32 %v575_v23, 0.0  ;;  %v590_v31 = vmax.f32 %v574_v24, 0.0  ;;  %1135 = vmatprep.mubr.bf16.mxu1 %v598_v25 }
  0xb5   : > { %v504_v32 = vpop.permute.xlu1 %503  ;;  %v499_v33 = vpop.permute.xlu0 %498 }
  0xb6   : > { %v569_v34 = vadd.f32 %v504_v32, %v457_v28  ;;  %v568_v35 = vadd.f32 %v499_v33, %v456_v29  ;;  %v602_v36 = vpack.c.bf16 %v591_v30, %v590_v31 }
  0xb8   : > { %v585_v39 = vmax.f32 %v569_v34, 0.0  ;;  %v584_v40 = vmax.f32 %v568_v35, 0.0  ;;  %1111 = vmatprep.mubr.bf16.mxu0 %v602_v36 }
  0xb9   : > { %v544_v41 = vpop.permute.xlu1 %543  ;;  %v539_v42 = vpop.permute.xlu0 %538 }
  0xba   : > { %v599_v43 = vpack.c.bf16 %v585_v39, %v584_v40  ;;  %v577_v44 = vadd.f32 %v544_v41, %v465_v37  ;;  %v576_v45 = vadd.f32 %v539_v42, %v464_v38 }
  0xbc   : > { %v593_v46 = vmax.f32 %v577_v44, 0.0  ;;  %v592_v47 = vmax.f32 %v576_v45, 0.0  ;;  %1136 = vmatmul.mubr.bf16.vlgmr.msra.gmra.mxu1 %v599_v43 }
  0xbd   : > { %v402_v48 = vpop.permute.xlu1 %401  ;;  %v397_v49 = vpop.permute.xlu0 %396 }
  0xbe   : > { %v603_v50 = vpack.c.bf16 %v593_v46, %v592_v47  ;;  %v459_v61 = vmul.f32 %v1043_v56, %v402_v48  ;;  %v458_v62 = vmul.f32 %v1042_v57, %v397_v49 }
  0xc0   : > { %1112 = vmatmul.mubr.bf16.vlgmr.msra.gmra.mxu0 %v603_v50 }
  0xc1   : > { %v442_v51 = vpop.permute.xlu1 %441  ;;  %v437_v52 = vpop.permute.xlu0 %436 }
  0xc2   : > { %v467_v8 = vmul.f32 %v1059_v63, %v442_v51  ;;  %v466_v9 = vmul.f32 %v1058_v0, %v437_v52 }
  0xc5   : > { %v412_v54 = vpop.permute.xlu1 %411  ;;  %v407_v55 = vpop.permute.xlu0 %406 }
  0xc6   : > { %v461_v20 = vmul.f32 %v1047_v6, %v412_v54  ;;  %v460_v21 = vmul.f32 %v1046_v7, %v407_v55 }
  0xc9   : > { %v452_v59 = vpop.permute.xlu1 %451  ;;  %v447_v60 = vpop.permute.xlu0 %446 }
  0xca   : > { %v469_v29 = vmul.f32 %v1063_v18, %v452_v59  ;;  %v468_v30 = vmul.f32 %v1062_v19, %v447_v60 }
  0xcd   : > { %v514_v2 = vpop.permute.xlu1 %513  ;;  %v509_v3 = vpop.permute.xlu0 %508 }
  0xce   : > { %v571_v4 = vadd.f32 %v514_v2, %v459_v61  ;;  %v570_v5 = vadd.f32 %v509_v3, %v458_v62 }
  0xd0   : > { %v587_v11 = vmax.f32 %v571_v4, 0.0  ;;  %v586_v12 = vmax.f32 %v570_v5, 0.0 }
  0xd1   : > { %v554_v13 = vpop.permute.xlu1 %553  ;;  %v549_v14 = vpop.permute.xlu0 %548 }
  0xd2   : > { %v600_v15 = vpack.c.bf16 %v587_v11, %v586_v12  ;;  %v579_v16 = vadd.f32 %v554_v13, %v467_v8  ;;  %v578_v17 = vadd.f32 %v549_v14, %v466_v9 }
  0xd4   : > { %v595_v22 = vmax.f32 %v579_v16, 0.0  ;;  %v594_v23 = vmax.f32 %v578_v17, 0.0  ;;  %1139 = vmatprep.mubr.bf16.mxu1 %v600_v15 }
  0xd5   : > { %v524_v24 = vpop.permute.xlu1 %523  ;;  %v519_v25 = vpop.permute.xlu0 %518 }
  0xd6   : > { %v604_v26 = vpack.c.bf16 %v595_v22, %v594_v23  ;;  %v573_v27 = vadd.f32 %v524_v24, %v461_v20  ;;  %v572_v28 = vadd.f32 %v519_v25, %v460_v21 }
  0xd8   : > { %v589_v31 = vmax.f32 %v573_v27, 0.0  ;;  %v588_v32 = vmax.f32 %v572_v28, 0.0  ;;  %1115 = vmatprep.mubr.bf16.mxu0 %v604_v26 }
  0xd9   : > { %v564_v33 = vpop.permute.xlu1 %563  ;;  %v559_v34 = vpop.permute.xlu0 %558 }
  0xda   : > { %v601_v35 = vpack.c.bf16 %v589_v31, %v588_v32  ;;  %v581_v36 = vadd.f32 %v564_v33, %v469_v29  ;;  %v580_v37 = vadd.f32 %v559_v34, %v468_v30 }
  0xdc   : > { %v597_v38 = vmax.f32 %v581_v36, 0.0  ;;  %v596_v39 = vmax.f32 %v580_v37, 0.0  ;;  %1140 = vmatmul.mubr.bf16.gmra.mxu1 %v601_v35 }
  0xde   : > { %v605_v40 = vpack.c.bf16 %v597_v38, %v596_v39 }
  0xe0   : > { %1116 = vmatmul.mubr.bf16.gmra.mxu0 %v605_v40 }
 0x17c   : > { %v1137_v41 = vpop.f32.mrf.mxu1 }
 0x17e   : > { %v833_v42 = vpop.f32.mrf.mxu1 }
 0x180   : > { %v1113_v43 = vpop.f32.mrf.mxu0  ;;  %v1138_v45 = vpop.f32.mrf.mxu1 }
 0x181   : > { %v842_v44 = vadd.f32 %v1137_v41, %v1113_v43 }
 0x182   : > { %v720_v46 = vpop.f32.mrf.mxu0  ;;  %v836_v50 = vpop.f32.mrf.mxu1 }
 0x183   : > { %866 = vst [vmem:[%s1442_s18 + $0x10] sm:$0xff] %v842_v44  ;;  %v834_v47 = vadd.f32 %v833_v42, %v720_v46 }
 0x184   : > { %v1114_v48 = vpop.f32.mrf.mxu0 }
 0x185   : > { %864 = vst [vmem:[%s1442_s18] sm:$0xff] %v834_v47  ;;  %v845_v49 = vadd.f32 %v1138_v45, %v1114_v48 }
 0x186   : > { %v723_v51 = vpop.f32.mrf.mxu0 }
 0x187   : > { %867 = vst [vmem:[%s1442_s18 + $0x18] sm:$0xff] %v845_v49  ;;  %v837_v52 = vadd.f32 %v836_v50, %v723_v51 }
 0x189   : > { %865 = vst [vmem:[%s1442_s18 + $0x8] sm:$0xff] %v837_v52 }
 0x18a   : > { %v928_v3 = vld [vmem:[%s1442_s18 + $0x10] sm:$0xff] (%p1271_p5) }
 0x18b   : > { %929 = vst [vmem:[%s881_s28 + $0x20] sm:$0xff] (%p1271_p5), %v928_v3 }
 0x18c   : > { %v924_v1 = vld [vmem:[%s1442_s18] sm:$0xff] (%p1271_p5) }
 0x18d   : > { %925 = vst [vmem:[%s881_s28] sm:$0xff] (%p1271_p5), %v924_v1 }
 0x18e   : > { %v930_v4 = vld [vmem:[%s1442_s18 + $0x18] sm:$0xff] (%p1271_p5) }
 0x18f   : > { %931 = vst [vmem:[%s881_s28 + $0x28] sm:$0xff] (%p1271_p5), %v930_v4 }
 0x190   : > { %v926_v2 = vld [vmem:[%s1442_s18 + $0x8] sm:$0xff] (%p1271_p5) }
 0x191   : > { %927 = vst [vmem:[%s881_s28 + $0x8] sm:$0xff] (%p1271_p5), %v926_v2 }
 0x19c   : > { %v1141_v53 = vpop.f32.mrf.mxu1 }
 0x19e   : > { %v849_v54 = vpop.f32.mrf.mxu1 }
 0x1a0   : > { %v1117_v55 = vpop.f32.mrf.mxu0  ;;  %v1142_v57 = vpop.f32.mrf.mxu1 }
 0x1a1   : > { %v858_v56 = vadd.f32 %v1141_v53, %v1117_v55 }
 0x1a2   : > { %v736_v58 = vpop.f32.mrf.mxu0  ;;  %v852_v62 = vpop.f32.mrf.mxu1 }
 0x1a3   : > { %870 = vst [vmem:[%s1442_s18 + $0x30] sm:$0xff] %v858_v56  ;;  %v850_v59 = vadd.f32 %v849_v54, %v736_v58 }
 0x1a4   : > { %v1118_v60 = vpop.f32.mrf.mxu0 }
 0x1a5   : > { %868 = vst [vmem:[%s1442_s18 + $0x20] sm:$0xff] %v850_v59  ;;  %v861_v61 = vadd.f32 %v1142_v57, %v1118_v60  ;;  %878 = sbr.rel (!%p1271_p5) target bundleno = 434 (0x1b2), region = 85 }
 0x1a6   : > { %v739_v63 = vpop.f32.mrf.mxu0 }
 0x1a7   : > { %871 = vst [vmem:[%s1442_s18 + $0x38] sm:$0xff] %v861_v61  ;;  %v853_v0 = vadd.f32 %v852_v62, %v739_v63 }
 0x1a9   : > { %869 = vst [vmem:[%s1442_s18 + $0x28] sm:$0xff] %v853_v0 }
 0x1aa   : > { %v936_v7 = vld [vmem:[%s1442_s18 + $0x30] sm:$0xff] }
 0x1ab   : > { %937 = vst [vmem:[%s881_s28 + $0x60] sm:$0xff] %v936_v7 }
 0x1ac   : > { %v932_v5 = vld [vmem:[%s1442_s18 + $0x20] sm:$0xff] }
 0x1ad   : > { %933 = vst [vmem:[%s881_s28 + $0x40] sm:$0xff] %v932_v5 }
 0x1ae   : > { %v938_v8 = vld [vmem:[%s1442_s18 + $0x38] sm:$0xff] }
 0x1af   : > { %939 = vst [vmem:[%s881_s28 + $0x68] sm:$0xff] %v938_v8 }
 0x1b0   : > { %v934_v6 = vld [vmem:[%s1442_s18 + $0x28] sm:$0xff] }
 0x1b1   : > { %935 = vst [vmem:[%s881_s28 + $0x48] sm:$0xff] %v934_v6 }
 0x1b2 PF: > { %p12_p10 = scmp.ge.s32.totalorder %s1258_s22, 4   ;;  %s1484_s18 = smov %s1204_s19 }
 0x1b3   : > { %s1485_s19 = smov %s1269_s25  ;;  %s1486_s20 = smov %s1258_s22 }
 0x1b4   :  { %14 = sbr.rel (!%p12_p10) target bundleno = 2 (0x2), region = 154 }

</bundles_post_ra>
